<compile_context>
chip_gen: v7x
topology: tpu7x:2x2x1
jax: 0.10.0
libtpu: 0.0.40
codegen_flags: <defaults>
</compile_context>

<pallas_src>
import functools

import jax
import jax.numpy as jnp
from jax.experimental import pallas as pl
from jax.experimental.pallas import tpu as pltpu


def _round_up(x, m):
    return (x + m - 1) // m * m


# ----------------------------------------------------------------------------
# Fused whole-model kernel: all 8 layers computed back-to-back in VMEM for one
# batch tile.  Weights/biases are packed blobs, sliced with static offsets.
# ----------------------------------------------------------------------------
def _autoencoder_kernel(x_ref, w_ref, b_ref, o_ref, *, layer_specs):
    # x_ref : (TB, D0_pad)      bf16 activations for this batch tile
    # w_ref : (W_rows, W_cols)  bf16, all weights packed row-wise (VMEM-resident)
    # b_ref : (1, B_cols)       f32,  all biases concatenated along lanes
    # o_ref : (TB, Dout_pad)    f32 reconstruction
    h = x_ref[...]                                        # bf16 (TB, D0_pad)

    for row_off, k_pad, n_pad, b_off, kind in layer_specs:
        w = w_ref[row_off:row_off + k_pad, 0:n_pad]       # static slice, bf16
        b = b_ref[0:1, b_off:b_off + n_pad]               # (1, n_pad) f32
        # bf16 x bf16 MXU matmul, f32 accumulation; epilogue in f32.
        y = jnp.dot(h, w, preferred_element_type=jnp.float32) + b

        if kind == "sigmoid":                             # final decoder layer
            o_ref[...] = jax.nn.sigmoid(y).astype(o_ref.dtype)
        elif kind == "relu":                              # hidden layer (+ Dropout=id)
            h = jnp.maximum(y, 0.0).astype(jnp.bfloat16)
        else:                                             # latent projection, no act
            h = y.astype(jnp.bfloat16)


# ----------------------------------------------------------------------------
# Parameter packing: one bf16 weight blob + one f32 bias row.
# ----------------------------------------------------------------------------
def pack_params(enc_params, dec_params):
    layers = list(enc_params) + list(dec_params)
    n_enc = len(enc_params)
    n_layers = len(layers)

    specs, raw_dims = [], []
    row_off, col_off, max_n_pad = 0, 0, 0
    for i, (w, _) in enumerate(layers):
        k, n = w.shape
        k_pad = _round_up(k, 128)
        n_pad = _round_up(n, 128)
        max_n_pad = max(max_n_pad, n_pad)
        if i == n_layers - 1:
            kind = "sigmoid"
        elif i == n_enc - 1:
            kind = "none"
        else:
            kind = "relu"
        specs.append((row_off, k_pad, n_pad, col_off, kind))
        raw_dims.append((k, n))
        row_off += k_pad
        col_off += n_pad

    w_blob = jnp.zeros((row_off, max_n_pad), jnp.bfloat16)
    b_blob = jnp.zeros((1, col_off), jnp.float32)
    for (w, b), (ro, _, _, co, _), (k, n) in zip(layers, specs, raw_dims):
        w_blob = w_blob.at[ro:ro + k, :n].set(w.astype(jnp.bfloat16))
        b_blob = b_blob.at[0:1, co:co + n].set(
            jnp.asarray(b, jnp.float32).reshape(1, n))
    return w_blob, b_blob, tuple(specs)


# ----------------------------------------------------------------------------
# Forward pass: one pallas_call, 1-D grid over the batch.
# ----------------------------------------------------------------------------
def autoencoder_forward(x, w_blob, b_blob, layer_specs, input_dim, out_chw):
    B = x.shape[0]
    D = input_dim
    D_pad = _round_up(D, 128)
    D_out_pad = layer_specs[-1][2]                      # padded final-layer width

    h = x.reshape(B, -1).astype(jnp.bfloat16)           # NCHW row-major flatten

    # Batch tile: 256 fills a 256x256 MXU pass (v6e/v7x) and is a 2x128 multiple
    # for v5e's four 128-row MXUs; small demo batches use the 8-sublane minimum.
    TB = 256 if B >= 256 else _round_up(B, 8)
    Bp = _round_up(B, TB)
    h = jnp.pad(h, ((0, Bp - B), (0, D_pad - D)))

    grid = (Bp // TB,)

    # Advisory cost estimate: params counted once (grid-resident), I/O once.
    flops = sum(2 * Bp * kp * npd for (_, kp, npd, _, _) in layer_specs)
    transcendentals = Bp * D_out_pad                    # final sigmoid
    bytes_accessed = (h.size * 2 + Bp * D_out_pad * 4
                      + w_blob.size * 2 + b_blob.size * 4)

    out = pl.pallas_call(
        functools.partial(_autoencoder_kernel, layer_specs=layer_specs),
        out_shape=jax.ShapeDtypeStruct((Bp, D_out_pad), jnp.float32),
        grid=grid,
        in_specs=[
            pl.BlockSpec((TB, D_pad), lambda i: (i, 0)),          # batch tile
            pl.BlockSpec(w_blob.shape, lambda i: (0, 0)),         # resident weights
            pl.BlockSpec(b_blob.shape, lambda i: (0, 0)),         # resident biases
        ],
        out_specs=pl.BlockSpec((TB, D_out_pad), lambda i: (i, 0)),
        compiler_params=pltpu.CompilerParams(
            dimension_semantics=("parallel",)),
        cost_estimate=pl.CostEstimate(
            flops=flops,
            transcendentals=transcendentals,
            bytes_accessed=bytes_accessed),
    )(h, w_blob, b_blob)

    C, Hh, Ww = out_chw
    return out[:B, :D].reshape(B, C, Hh, Ww)


# ----------------------------------------------------------------------------
# Parameter construction (PyTorch-style uniform init; f32, quantized on pack)
# ----------------------------------------------------------------------------
def init_params(key, input_dim, hidden_dims, latent_dim):
    dims_enc = [input_dim] + list(hidden_dims) + [latent_dim]
    dims_dec = [latent_dim] + list(reversed(hidden_dims)) + [input_dim]

    def make_chain(key, dims):
        layers = []
        for in_d, out_d in zip(dims[:-1], dims[1:]):
            key, kw, kb = jax.random.split(key, 3)
            bound = 1.0 / jnp.sqrt(in_d)
            w = jax.random.uniform(kw, (in_d, out_d), jnp.float32, -bound, bound)
            b = jax.random.uniform(kb, (out_d,), jnp.float32, -bound, bound)
            layers.append((w, b))
        return key, layers

    key, enc = make_chain(key, dims_enc)
    key, dec = make_chain(key, dims_dec)
    return enc, dec


if __name__ == "__main__":
    # Small configuration consistent with the module's structure:
    # BasicAutoencoder(input_dim=3*16*16, hidden_dims=[256,128,64], latent_dim=32)
    B, C, H, W = 2, 3, 16, 16
    input_dim = C * H * W
    hidden_dims = [256, 128, 64]
    latent_dim = 32

    key = jax.random.PRNGKey(0)
    key, kx = jax.random.split(key)
    x = jax.random.normal(kx, (B, C, H, W), jnp.float32)

    enc_params, dec_params = init_params(key, input_dim, hidden_dims, latent_dim)
    w_blob, b_blob, layer_specs = pack_params(enc_params, dec_params)

    fwd = jax.jit(
        lambda x: autoencoder_forward(
            x, w_blob, b_blob, layer_specs, input_dim, (C, H, W)))
    out = fwd(x)
    jax.block_until_ready(out)

    assert out.shape == (B, C, H, W), out.shape
    assert bool(jnp.all(jnp.isfinite(out)))
    assert bool(jnp.all((out >= 0.0) & (out <= 1.0)))   # sigmoid output range
    print("KERNEL_OK")
</pallas_src>

<mosaic_0001>
module attributes {stable_mosaic.version = 11 : i64} {
  func.func @_autoencoder_kernel(%arg0: i32, %arg1: memref<8x768xbf16, #tpu.memory_space<vmem>>, %arg2: memref<1920x768xbf16, #tpu.memory_space<vmem>>, %arg3: memref<1x1920xf32, #tpu.memory_space<vmem>>, %arg4: memref<8x768xf32, #tpu.memory_space<vmem>>) attributes {dimension_semantics = [#tpu.dimension_semantics<parallel>], iteration_bounds = array<i64: 1>, scalar_prefetch = 0 : i64, scratch_operands = 0 : i64, tpu.core_type = #tpu.core_type<tc>, window_params = [{transform_indices = @transform_0, window_bounds = array<i64: 8, 768>}, {pipeline_mode = #tpu.pipeline_mode<synchronous>, transform_indices = @transform_1, window_bounds = array<i64: 1920, 768>}, {pipeline_mode = #tpu.pipeline_mode<synchronous>, transform_indices = @transform_2, window_bounds = array<i64: 1, 1920>}, {transform_indices = @transform_3, window_bounds = array<i64: 8, 768>}]} {
    %c0 = arith.constant 0 : index
    %c0_0 = arith.constant 0 : index
    %0 = vector.load %arg1[%c0, %c0_0] : memref<8x768xbf16, #tpu.memory_space<vmem>>, vector<8x768xbf16>
    %c0_1 = arith.constant 0 : index
    %c0_2 = arith.constant 0 : index
    %1 = vector.load %arg2[%c0_1, %c0_2] : memref<1920x768xbf16, #tpu.memory_space<vmem>>, vector<768x256xbf16>
    %c0_3 = arith.constant 0 : index
    %c0_4 = arith.constant 0 : index
    %2 = vector.load %arg3[%c0_3, %c0_4] : memref<1x1920xf32, #tpu.memory_space<vmem>>, vector<1x256xf32>
    %cst = arith.constant dense<0.000000e+00> : vector<8x256xf32>
    %3 = tpu.matmul %0, %1, %cst {dimension_numbers = #tpu.dot_dimension_numbers<[1], [0], [0], [1], [0, 0, 1, 1], [], []>} : vector<8x768xbf16>, vector<768x256xbf16>, vector<8x256xf32> -> vector<8x256xf32>
    %4 = vector.broadcast %2 : vector<1x256xf32> to vector<8x256xf32>
    %5 = arith.addf %3, %4 : vector<8x256xf32>
    %cst_5 = arith.constant 0.000000e+00 : f32
    %6 = vector.broadcast %cst_5 : f32 to vector<8x256xf32>
    %7 = arith.maximumf %5, %6 : vector<8x256xf32>
    %8 = arith.truncf %7 : vector<8x256xf32> to vector<8x256xbf16>
    %c768 = arith.constant 768 : index
    %c0_6 = arith.constant 0 : index
    %9 = vector.load %arg2[%c768, %c0_6] : memref<1920x768xbf16, #tpu.memory_space<vmem>>, vector<256x128xbf16>
    %c0_7 = arith.constant 0 : index
    %c256 = arith.constant 256 : index
    %10 = vector.load %arg3[%c0_7, %c256] : memref<1x1920xf32, #tpu.memory_space<vmem>>, vector<1x128xf32>
    %cst_8 = arith.constant dense<0.000000e+00> : vector<8x128xf32>
    %11 = tpu.matmul %8, %9, %cst_8 {dimension_numbers = #tpu.dot_dimension_numbers<[1], [0], [0], [1], [0, 0, 1, 1], [], []>} : vector<8x256xbf16>, vector<256x128xbf16>, vector<8x128xf32> -> vector<8x128xf32>
    %12 = vector.broadcast %10 : vector<1x128xf32> to vector<8x128xf32>
    %13 = arith.addf %11, %12 : vector<8x128xf32>
    %cst_9 = arith.constant 0.000000e+00 : f32
    %14 = vector.broadcast %cst_9 : f32 to vector<8x128xf32>
    %15 = arith.maximumf %13, %14 : vector<8x128xf32>
    %16 = arith.truncf %15 : vector<8x128xf32> to vector<8x128xbf16>
    %c1024 = arith.constant 1024 : index
    %c0_10 = arith.constant 0 : index
    %17 = vector.load %arg2[%c1024, %c0_10] : memref<1920x768xbf16, #tpu.memory_space<vmem>>, vector<128x128xbf16>
    %c0_11 = arith.constant 0 : index
    %c384 = arith.constant 384 : index
    %18 = vector.load %arg3[%c0_11, %c384] : memref<1x1920xf32, #tpu.memory_space<vmem>>, vector<1x128xf32>
    %cst_12 = arith.constant dense<0.000000e+00> : vector<8x128xf32>
    %19 = tpu.matmul %16, %17, %cst_12 {dimension_numbers = #tpu.dot_dimension_numbers<[1], [0], [0], [1], [0, 0, 1, 1], [], []>} : vector<8x128xbf16>, vector<128x128xbf16>, vector<8x128xf32> -> vector<8x128xf32>
    %20 = vector.broadcast %18 : vector<1x128xf32> to vector<8x128xf32>
    %21 = arith.addf %19, %20 : vector<8x128xf32>
    %cst_13 = arith.constant 0.000000e+00 : f32
    %22 = vector.broadcast %cst_13 : f32 to vector<8x128xf32>
    %23 = arith.maximumf %21, %22 : vector<8x128xf32>
    %24 = arith.truncf %23 : vector<8x128xf32> to vector<8x128xbf16>
    %c1152 = arith.constant 1152 : index
    %c0_14 = arith.constant 0 : index
    %25 = vector.load %arg2[%c1152, %c0_14] : memref<1920x768xbf16, #tpu.memory_space<vmem>>, vector<128x128xbf16>
    %c0_15 = arith.constant 0 : index
    %c512 = arith.constant 512 : index
    %26 = vector.load %arg3[%c0_15, %c512] : memref<1x1920xf32, #tpu.memory_space<vmem>>, vector<1x128xf32>
    %cst_16 = arith.constant dense<0.000000e+00> : vector<8x128xf32>
    %27 = tpu.matmul %24, %25, %cst_16 {dimension_numbers = #tpu.dot_dimension_numbers<[1], [0], [0], [1], [0, 0, 1, 1], [], []>} : vector<8x128xbf16>, vector<128x128xbf16>, vector<8x128xf32> -> vector<8x128xf32>
    %28 = vector.broadcast %26 : vector<1x128xf32> to vector<8x128xf32>
    %29 = arith.addf %27, %28 : vector<8x128xf32>
    %30 = arith.truncf %29 : vector<8x128xf32> to vector<8x128xbf16>
    %c1280 = arith.constant 1280 : index
    %c0_17 = arith.constant 0 : index
    %31 = vector.load %arg2[%c1280, %c0_17] : memref<1920x768xbf16, #tpu.memory_space<vmem>>, vector<128x128xbf16>
    %c0_18 = arith.constant 0 : index
    %c640 = arith.constant 640 : index
    %32 = vector.load %arg3[%c0_18, %c640] : memref<1x1920xf32, #tpu.memory_space<vmem>>, vector<1x128xf32>
    %cst_19 = arith.constant dense<0.000000e+00> : vector<8x128xf32>
    %33 = tpu.matmul %30, %31, %cst_19 {dimension_numbers = #tpu.dot_dimension_numbers<[1], [0], [0], [1], [0, 0, 1, 1], [], []>} : vector<8x128xbf16>, vector<128x128xbf16>, vector<8x128xf32> -> vector<8x128xf32>
    %34 = vector.broadcast %32 : vector<1x128xf32> to vector<8x128xf32>
    %35 = arith.addf %33, %34 : vector<8x128xf32>
    %cst_20 = arith.constant 0.000000e+00 : f32
    %36 = vector.broadcast %cst_20 : f32 to vector<8x128xf32>
    %37 = arith.maximumf %35, %36 : vector<8x128xf32>
    %38 = arith.truncf %37 : vector<8x128xf32> to vector<8x128xbf16>
    %c1408 = arith.constant 1408 : index
    %c0_21 = arith.constant 0 : index
    %39 = vector.load %arg2[%c1408, %c0_21] : memref<1920x768xbf16, #tpu.memory_space<vmem>>, vector<128x128xbf16>
    %c0_22 = arith.constant 0 : index
    %c768_23 = arith.constant 768 : index
    %40 = vector.load %arg3[%c0_22, %c768_23] : memref<1x1920xf32, #tpu.memory_space<vmem>>, vector<1x128xf32>
    %cst_24 = arith.constant dense<0.000000e+00> : vector<8x128xf32>
    %41 = tpu.matmul %38, %39, %cst_24 {dimension_numbers = #tpu.dot_dimension_numbers<[1], [0], [0], [1], [0, 0, 1, 1], [], []>} : vector<8x128xbf16>, vector<128x128xbf16>, vector<8x128xf32> -> vector<8x128xf32>
    %42 = vector.broadcast %40 : vector<1x128xf32> to vector<8x128xf32>
    %43 = arith.addf %41, %42 : vector<8x128xf32>
    %cst_25 = arith.constant 0.000000e+00 : f32
    %44 = vector.broadcast %cst_25 : f32 to vector<8x128xf32>
    %45 = arith.maximumf %43, %44 : vector<8x128xf32>
    %46 = arith.truncf %45 : vector<8x128xf32> to vector<8x128xbf16>
    %c1536 = arith.constant 1536 : index
    %c0_26 = arith.constant 0 : index
    %47 = vector.load %arg2[%c1536, %c0_26] : memref<1920x768xbf16, #tpu.memory_space<vmem>>, vector<128x256xbf16>
    %c0_27 = arith.constant 0 : index
    %c896 = arith.constant 896 : index
    %48 = vector.load %arg3[%c0_27, %c896] : memref<1x1920xf32, #tpu.memory_space<vmem>>, vector<1x256xf32>
    %cst_28 = arith.constant dense<0.000000e+00> : vector<8x256xf32>
    %49 = tpu.matmul %46, %47, %cst_28 {dimension_numbers = #tpu.dot_dimension_numbers<[1], [0], [0], [1], [0, 0, 1, 1], [], []>} : vector<8x128xbf16>, vector<128x256xbf16>, vector<8x256xf32> -> vector<8x256xf32>
    %50 = vector.broadcast %48 : vector<1x256xf32> to vector<8x256xf32>
    %51 = arith.addf %49, %50 : vector<8x256xf32>
    %cst_29 = arith.constant 0.000000e+00 : f32
    %52 = vector.broadcast %cst_29 : f32 to vector<8x256xf32>
    %53 = arith.maximumf %51, %52 : vector<8x256xf32>
    %54 = arith.truncf %53 : vector<8x256xf32> to vector<8x256xbf16>
    %c1664 = arith.constant 1664 : index
    %c0_30 = arith.constant 0 : index
    %55 = vector.load %arg2[%c1664, %c0_30] : memref<1920x768xbf16, #tpu.memory_space<vmem>>, vector<256x768xbf16>
    %c0_31 = arith.constant 0 : index
    %c1152_32 = arith.constant 1152 : index
    %56 = vector.load %arg3[%c0_31, %c1152_32] : memref<1x1920xf32, #tpu.memory_space<vmem>>, vector<1x768xf32>
    %cst_33 = arith.constant dense<0.000000e+00> : vector<8x768xf32>
    %57 = tpu.matmul %54, %55, %cst_33 {dimension_numbers = #tpu.dot_dimension_numbers<[1], [0], [0], [1], [0, 0, 1, 1], [], []>} : vector<8x256xbf16>, vector<256x768xbf16>, vector<8x768xf32> -> vector<8x768xf32>
    %58 = vector.broadcast %56 : vector<1x768xf32> to vector<8x768xf32>
    %59 = arith.addf %57, %58 : vector<8x768xf32>
    %60 = arith.negf %59 : vector<8x768xf32>
    %61 = math.exp %60 : vector<8x768xf32>
    %cst_34 = arith.constant 1.000000e+00 : f32
    %62 = vector.broadcast %cst_34 : f32 to vector<8x768xf32>
    %63 = arith.addf %62, %61 : vector<8x768xf32>
    %64 = arith.divf %62, %63 : vector<8x768xf32>
    %c0_35 = arith.constant 0 : index
    %c0_36 = arith.constant 0 : index
    %65 = vector.load %arg4[%c0_35, %c0_36] : memref<8x768xf32, #tpu.memory_space<vmem>>, vector<8x768xf32>
    tpu.vector_store %arg4[%c0_35, %c0_36], %64 {strides = array<i32>} : memref<8x768xf32, #tpu.memory_space<vmem>>, vector<8x768xf32>,
    return
  }
  func.func @transform_0(%arg0: i32) -> (i32, i32) {
    %c0_i32 = arith.constant 0 : i32
    %c0_i32_0 = arith.constant 0 : i32
    return %arg0, %c0_i32 : i32, i32
  }
  func.func @transform_1(%arg0: i32) -> (i32, i32) {
    %c0_i32 = arith.constant 0 : i32
    %c0_i32_0 = arith.constant 0 : i32
    %c0_i32_1 = arith.constant 0 : i32
    return %c0_i32, %c0_i32_0 : i32, i32
  }
  func.func @transform_2(%arg0: i32) -> (i32, i32) {
    %c0_i32 = arith.constant 0 : i32
    %c0_i32_0 = arith.constant 0 : i32
    %c0_i32_1 = arith.constant 0 : i32
    return %c0_i32, %c0_i32_0 : i32, i32
  }
  func.func @transform_3(%arg0: i32) -> (i32, i32) {
    %c0_i32 = arith.constant 0 : i32
    %c0_i32_0 = arith.constant 0 : i32
    return %arg0, %c0_i32 : i32, i32
  }
}

</mosaic_0001>

<bundles_post_ra>
// kernel: _lambda_.1
= control target key start
LH: loop header
LB: loop body
LE: loop exit
PB: predicated region body
PF: predicated region fallthrough
CT: control target
= control target key end

     0   :  { %vm3127_vm0 = vmmov 0   ;;  %s4043_s1 = inlined_call_operand.vmem [shape: bf16[1920,768], index: 1, kind: input, shape index: {}]   ;;  %s4044_s0 = inlined_call_operand.vmem [shape: bf16[8,768], index: 0, kind: input, shape index: {}]   ;;  %s4045_s2 = inlined_call_operand.vmem [shape: f32[1,1920], index: 2, kind: input, shape index: {}]   ;;  %s4046_s3 = inlined_call_operand.vmem [shape: f32[8,768], index: 3, kind: output, shape index: {}]  }
   0x1   :  { %v2736_v0 = vld [vmem:[%s4043_s1 + $0x4] ss:$24 sps:$4 sm:$0xff]   ;;  %v2738_v1 = vld [vmem:[%s4043_s1] ss:$24 sps:$4 sm:$0xff]   ;;  %v2739_v2 = vld [vmem:[%s4043_s1 + $0x34] ss:$24 sps:$4 sm:$0xff]  }
   0x2   :  { %627 = vmatprep.subr.bf16.mxu0 %v2736_v0  ;;  %v2741_v3 = vld [vmem:[%s4043_s1 + $0x30] ss:$24 sps:$4 sm:$0xff]   ;;  %v2742_v4 = vld [vmem:[%s4043_s1 + $0x64] ss:$24 sps:$4 sm:$0xff]   ;;  %v2744_v5 = vld [vmem:[%s4043_s1 + $0x60] ss:$24 sps:$4 sm:$0xff]  }
   0x3   :  { %628 = vmatpush1.bf16.msra.mxu0 %v2738_v1  ;;  %v2745_v6 = vld [vmem:[%s4043_s1 + $0x94] ss:$24 sps:$4 sm:$0xff]   ;;  %v2747_v7 = vld [vmem:[%s4043_s1 + $0x90] ss:$24 sps:$4 sm:$0xff]   ;;  %v2748_v8 = vld [vmem:[%s4043_s1 + $0xc4] ss:$24 sps:$4 sm:$0xff]  }
   0x4   :  { %629 = vmatprep.subr.bf16.mxu0 %v2739_v2  ;;  %v2750_v9 = vld [vmem:[%s4043_s1 + $0xc0] ss:$24 sps:$4 sm:$0xff]   ;;  %v2751_v10 = vld [vmem:[%s4043_s1 + $0xf4] ss:$24 sps:$4 sm:$0xff]   ;;  %v2753_v11 = vld [vmem:[%s4043_s1 + $0xf0] ss:$24 sps:$4 sm:$0xff]  }
   0x5   :  { %v2754_v12 = vld [vmem:[%s4043_s1 + $0x124] ss:$24 sps:$4 sm:$0xff]   ;;  %v2756_v15 = vld [vmem:[%s4043_s1 + $0x120] ss:$24 sps:$4 sm:$0xff]   ;;  %v2757_v16 = vld [vmem:[%s4043_s1 + $0x154] ss:$24 sps:$4 sm:$0xff]  }
   0x6   :  { %v15_v13 = vld [vmem:[%s4044_s0] sm:$0xff]  ;;  %v2759_v17 = vld [vmem:[%s4043_s1 + $0x150] ss:$24 sps:$4 sm:$0xff]   ;;  %v2763_v20 = vld [vmem:[%s4043_s1 + $0x1b4] ss:$24 sps:$4 sm:$0xff]  }
   0x7   :  { %630 = vmatpush1.bf16.msra.mxu0 %v2741_v3  ;;  %v2313_v14 = vcombine.high %v15_v13, %v15_v13  ;;  %v2760_v18 = vld [vmem:[%s4043_s1 + $0x184] ss:$24 sps:$4 sm:$0xff]   ;;  %v2762_v19 = vld [vmem:[%s4043_s1 + $0x180] ss:$24 sps:$4 sm:$0xff]   ;;  %v2765_v21 = vld [vmem:[%s4043_s1 + $0x1b0] ss:$24 sps:$4 sm:$0xff]   ;;  %v2312_v36 = vcombine.low %v15_v13, %v15_v13 }
   0x8   :  { %631 = vmatprep.subr.bf16.mxu0 %v2742_v4  ;;  %v2766_v22 = vld [vmem:[%s4043_s1 + $0x1e4] ss:$24 sps:$4 sm:$0xff]   ;;  %v2768_v23 = vld [vmem:[%s4043_s1 + $0x1e0] ss:$24 sps:$4 sm:$0xff]   ;;  %v2769_v24 = vld [vmem:[%s4043_s1 + $0x214] ss:$24 sps:$4 sm:$0xff]  }
   0x9   :  { %659 = vmatprep.mubr.bf16.mxu0 %v2313_v14  ;;  %v2771_v25 = vld [vmem:[%s4043_s1 + $0x210] ss:$24 sps:$4 sm:$0xff]   ;;  %v2772_v26 = vld [vmem:[%s4043_s1 + $0x244] ss:$24 sps:$4 sm:$0xff]   ;;  %v2774_v27 = vld [vmem:[%s4043_s1 + $0x240] ss:$24 sps:$4 sm:$0xff]  }
   0xa   :  { %v2775_v28 = vld [vmem:[%s4043_s1 + $0x274] ss:$24 sps:$4 sm:$0xff]   ;;  %v2777_v29 = vld [vmem:[%s4043_s1 + $0x270] ss:$24 sps:$4 sm:$0xff]   ;;  %v2778_v30 = vld [vmem:[%s4043_s1 + $0x2a4] ss:$24 sps:$4 sm:$0xff]  }
   0xb   :  { %632 = vmatpush1.bf16.msra.mxu0 %v2744_v5  ;;  %v2780_v31 = vld [vmem:[%s4043_s1 + $0x2a0] ss:$24 sps:$4 sm:$0xff]   ;;  %v2781_v32 = vld [vmem:[%s4043_s1 + $0x2d4] ss:$24 sps:$4 sm:$0xff]   ;;  %v2783_v33 = vld [vmem:[%s4043_s1 + $0x2d0] ss:$24 sps:$4 sm:$0xff]  }
   0xc   :  { %633 = vmatprep.subr.bf16.mxu0 %v2745_v6  ;;  %v2788_v34 = vld [vmem:[%s4043_s1 + $0x304] ss:$24 sps:$4 sm:$0xff]   ;;  %v3254_v35 = vld [vmem:[%s4044_s0 + $0x8] sm:$0xff]  ;;  %v2786_v37 = vld [vmem:[%s4043_s1 + $0x300] ss:$24 sps:$4 sm:$0xff]  }
   0xd   :  { %v2315_v38 = vcombine.high %v3254_v35, %v3254_v35  ;;  %v2791_v39 = vld [vmem:[%s4043_s1 + $0x334] ss:$24 sps:$4 sm:$0xff]   ;;  %v2789_v40 = vld [vmem:[%s4043_s1 + $0x330] ss:$24 sps:$4 sm:$0xff]   ;;  %v2886_v41 = vld [vmem:[%s4043_s1 + $0xa80] ss:$24 sps:$4 sm:$0xff]  }
   0xe   :  { %v2887_v42 = vld [vmem:[%s4043_s1 + $0x900] ss:$24 sps:$4 sm:$0xff]   ;;  %v2888_v43 = vld [vmem:[%s4043_s1 + $0xab0] ss:$24 sps:$4 sm:$0xff]   ;;  %v2794_v44 = vld [vmem:[%s4043_s1 + $0x364] ss:$24 sps:$4 sm:$0xff]   ;;  %2585 = vmatprep.subr.bf16.mxu1 %v2886_v41 }
   0xf   :  { %634 = vmatpush1.bf16.msra.mxu0 %v2747_v7  ;;  %2586 = vmatpush3.bf16.msra.mxu1 %v2887_v42  ;;  %v2889_v45 = vld [vmem:[%s4043_s1 + $0x930] ss:$24 sps:$4 sm:$0xff]   ;;  %v2890_v46 = vld [vmem:[%s4043_s1 + $0xae0] ss:$24 sps:$4 sm:$0xff]   ;;  %v2797_v48 = vld [vmem:[%s4043_s1 + $0x394] ss:$24 sps:$4 sm:$0xff]  }
  0x10   :  { %635 = vmatprep.subr.bf16.mxu0 %v2748_v8  ;;  %2587 = vmatprep.subr.bf16.mxu1 %v2888_v43  ;;  %v2792_v47 = vld [vmem:[%s4043_s1 + $0x360] ss:$24 sps:$4 sm:$0xff]   ;;  %v2795_v49 = vld [vmem:[%s4043_s1 + $0x390] ss:$24 sps:$4 sm:$0xff]   ;;  %v2800_v52 = vld [vmem:[%s4043_s1 + $0x3c4] ss:$24 sps:$4 sm:$0xff]  }
  0x11   :  { %v2891_v50 = vld [vmem:[%s4043_s1 + $0x960] ss:$24 sps:$4 sm:$0xff]   ;;  %v2892_v51 = vld [vmem:[%s4043_s1 + $0xb10] ss:$24 sps:$4 sm:$0xff]   ;;  %v2803_v56 = vld [vmem:[%s4043_s1 + $0x3f4] ss:$24 sps:$4 sm:$0xff]  }
  0x12   :  { %v2893_v53 = vld [vmem:[%s4043_s1 + $0x990] ss:$24 sps:$4 sm:$0xff]   ;;  %v2798_v54 = vld [vmem:[%s4043_s1 + $0x3c0] ss:$24 sps:$4 sm:$0xff]   ;;  %v2806_v60 = vld [vmem:[%s4043_s1 + $0x424] ss:$24 sps:$4 sm:$0xff]  }
  0x13   :  { %636 = vmatpush1.bf16.msra.mxu0 %v2750_v9  ;;  %2588 = vmatpush3.bf16.msra.mxu1 %v2889_v45  ;;  %v2894_v55 = vld [vmem:[%s4043_s1 + $0xb40] ss:$24 sps:$4 sm:$0xff]   ;;  %v2896_v58 = vld [vmem:[%s4043_s1 + $0xb70] ss:$24 sps:$4 sm:$0xff]   ;;  %v2809_v63 = vld [vmem:[%s4043_s1 + $0x454] ss:$24 sps:$4 sm:$0xff]  }
  0x14   :  { %637 = vmatprep.subr.bf16.mxu0 %v2751_v10  ;;  %2589 = vmatprep.subr.bf16.mxu1 %v2890_v46  ;;  %v2895_v57 = vld [vmem:[%s4043_s1 + $0x9c0] ss:$24 sps:$4 sm:$0xff]   ;;  %v2801_v59 = vld [vmem:[%s4043_s1 + $0x3f0] ss:$24 sps:$4 sm:$0xff]   ;;  %v2812_v1 = vld [vmem:[%s4043_s1 + $0x484] ss:$24 sps:$4 sm:$0xff]  }
  0x15   :  { %v2897_v61 = vld [vmem:[%s4043_s1 + $0x9f0] ss:$24 sps:$4 sm:$0xff]   ;;  %v2804_v62 = vld [vmem:[%s4043_s1 + $0x420] ss:$24 sps:$4 sm:$0xff]   ;;  %v2815_v3 = vld [vmem:[%s4043_s1 + $0x4b4] ss:$24 sps:$4 sm:$0xff]  }
  0x16   :  { %v2807_v0 = vld [vmem:[%s4043_s1 + $0x450] ss:$24 sps:$4 sm:$0xff]   ;;  %v2810_v2 = vld [vmem:[%s4043_s1 + $0x480] ss:$24 sps:$4 sm:$0xff]   ;;  %v2818_v5 = vld [vmem:[%s4043_s1 + $0x4e4] ss:$24 sps:$4 sm:$0xff]  }
  0x17   :  { %638 = vmatpush1.bf16.msra.mxu0 %v2753_v11  ;;  %2590 = vmatpush3.bf16.msra.mxu1 %v2891_v50  ;;  %v2813_v4 = vld [vmem:[%s4043_s1 + $0x4b0] ss:$24 sps:$4 sm:$0xff]   ;;  %v2816_v6 = vld [vmem:[%s4043_s1 + $0x4e0] ss:$24 sps:$4 sm:$0xff]   ;;  %v2821_v7 = vld [vmem:[%s4043_s1 + $0x514] ss:$24 sps:$4 sm:$0xff]  }
  0x18   :  { %639 = vmatprep.subr.bf16.mxu0 %v2754_v12  ;;  %2591 = vmatprep.subr.bf16.mxu1 %v2892_v51  ;;  %v2819_v8 = vld [vmem:[%s4043_s1 + $0x510] ss:$24 sps:$4 sm:$0xff]   ;;  %v2824_v9 = vld [vmem:[%s4043_s1 + $0x544] ss:$24 sps:$4 sm:$0xff]   ;;  %v2822_v10 = vld [vmem:[%s4043_s1 + $0x540] ss:$24 sps:$4 sm:$0xff]  }
  0x19   :  { %v2827_v11 = vld [vmem:[%s4043_s1 + $0x574] ss:$24 sps:$4 sm:$0xff]   ;;  %v2825_v12 = vld [vmem:[%s4043_s1 + $0x570] ss:$24 sps:$4 sm:$0xff]   ;;  %v2830_v13 = vld [vmem:[%s4043_s1 + $0x5a4] ss:$24 sps:$4 sm:$0xff]  }
  0x1a   :  { %v2828_v14 = vld [vmem:[%s4043_s1 + $0x5a0] ss:$24 sps:$4 sm:$0xff]   ;;  %v2871_v42 = vld [vmem:[%s4043_s1 + $0x814] ss:$24 sps:$4 sm:$0xff]   ;;  %v2869_v43 = vld [vmem:[%s4043_s1 + $0x810] ss:$24 sps:$4 sm:$0xff]  }
  0x1b   :  { %640 = vmatpush1.bf16.msra.mxu0 %v2756_v15  ;;  %2592 = vmatpush3.bf16.msra.mxu1 %v2893_v53  ;;  %v2833_v15 = vld [vmem:[%s4043_s1 + $0x5d4] ss:$24 sps:$4 sm:$0xff]   ;;  %v2866_v41 = vld [vmem:[%s4043_s1 + $0x7e0] ss:$24 sps:$4 sm:$0xff]   ;;  %v2881_v51 = vld [vmem:[%s4043_s1 + $0x8d0] ss:$24 sps:$4 sm:$0xff]  }
  0x1c   :  { %641 = vmatprep.subr.bf16.mxu0 %v2757_v16  ;;  %2593 = vmatprep.subr.bf16.mxu1 %v2894_v55  ;;  %v2831_v16 = vld [vmem:[%s4043_s1 + $0x5d0] ss:$24 sps:$4 sm:$0xff]   ;;  %v2872_v45 = vld [vmem:[%s4043_s1 + $0x840] ss:$24 sps:$4 sm:$0xff]   ;;  %v2877_v46 = vld [vmem:[%s4043_s1 + $0x874] ss:$24 sps:$4 sm:$0xff]  }
  0x1d   :  { %v2883_v50 = vld [vmem:[%s4043_s1 + $0x8d4] ss:$24 sps:$4 sm:$0xff]   ;;  %v2898_v53 = vld [vmem:[%s4043_s1 + $0xba0] ss:$24 sps:$4 sm:$0xff]   ;;  %v2900_v55 = vld [vmem:[%s4043_s1 + $0xbd0] ss:$24 sps:$4 sm:$0xff]  }
  0x1f   :  { %642 = vmatpush1.bf16.msra.mxu0 %v2759_v17  ;;  %2594 = vmatpush3.bf16.msra.mxu1 %v2895_v57  ;;  %v2838_v17 = vld [vmem:[%s4043_s1 + $0x604] ss:$24 sps:$4 sm:$0xff]   ;;  %v3126_v57 = vmov 0.0  }
  0x20   :  { %643 = vmatprep.subr.bf16.mxu0 %v2760_v18  ;;  %2595 = vmatprep.subr.bf16.mxu1 %v2896_v58  ;;  %v3393_v18 = vld [vmem:[%s4044_s0 + $0x10] sm:$0xff]  ;;  %v116_v58 = vlaneseq }
  0x23   :  { %644 = vmatpush1.bf16.msra.mxu0 %v2762_v19  ;;  %2596 = vmatpush3.bf16.msra.mxu1 %v2897_v61  ;;  %v2836_v19 = vld [vmem:[%s4043_s1 + $0x600] ss:$24 sps:$4 sm:$0xff]  }
  0x24   :  { %645 = vmatprep.subr.bf16.mxu0 %v2763_v20  ;;  %v2314_v20 = vcombine.low %v3254_v35, %v3254_v35  ;;  %v2857_v35 = vld [vmem:[%s4043_s1 + $0x750] ss:$24 sps:$4 sm:$0xff]   ;;  %2597 = vmatprep.subr.bf16.mxu1 %v2898_v53  ;;  %v114_v61 = vld [vmem:[%s4045_s2] sm:$0x3] }
  0x27   :  { %646 = vmatpush1.bf16.msra.mxu0 %v2765_v21  ;;  %v2841_v21 = vld [vmem:[%s4043_s1 + $0x634] ss:$24 sps:$4 sm:$0xff]  }
  0x28   :  { %647 = vmatprep.subr.bf16.mxu0 %v2766_v22  ;;  %v2317_v22 = vcombine.high %v3393_v18, %v3393_v18 }
  0x2b   :  { %648 = vmatpush1.bf16.msra.mxu0 %v2768_v23  ;;  %v2839_v23 = vld [vmem:[%s4043_s1 + $0x630] ss:$24 sps:$4 sm:$0xff]  }
  0x2c   :  { %649 = vmatprep.subr.bf16.mxu0 %v2769_v24  ;;  %v2844_v24 = vld [vmem:[%s4043_s1 + $0x664] ss:$24 sps:$4 sm:$0xff]  }
  0x2f   :  { %650 = vmatpush1.bf16.msra.mxu0 %v2771_v25  ;;  %v2842_v25 = vld [vmem:[%s4043_s1 + $0x660] ss:$24 sps:$4 sm:$0xff]  }
  0x30   :  { %651 = vmatprep.subr.bf16.mxu0 %v2772_v26  ;;  %v2847_v26 = vld [vmem:[%s4043_s1 + $0x694] ss:$24 sps:$4 sm:$0xff]  }
  0x33   :  { %652 = vmatpush1.bf16.msra.mxu0 %v2774_v27  ;;  %v2845_v27 = vld [vmem:[%s4043_s1 + $0x690] ss:$24 sps:$4 sm:$0xff]  }
  0x34   :  { %653 = vmatprep.subr.bf16.mxu0 %v2775_v28  ;;  %v2850_v28 = vld [vmem:[%s4043_s1 + $0x6c4] ss:$24 sps:$4 sm:$0xff]  }
  0x37   :  { %654 = vmatpush1.bf16.msra.mxu0 %v2777_v29  ;;  %v2848_v29 = vld [vmem:[%s4043_s1 + $0x6c0] ss:$24 sps:$4 sm:$0xff]  }
  0x38   :  { %655 = vmatprep.subr.bf16.mxu0 %v2778_v30  ;;  %v2853_v30 = vld [vmem:[%s4043_s1 + $0x6f4] ss:$24 sps:$4 sm:$0xff]  }
  0x3b   :  { %656 = vmatpush1.bf16.msra.mxu0 %v2780_v31  ;;  %v2851_v31 = vld [vmem:[%s4043_s1 + $0x6f0] ss:$24 sps:$4 sm:$0xff]  }
  0x3c   :  { %657 = vmatprep.subr.bf16.mxu0 %v2781_v32  ;;  %v2856_v32 = vld [vmem:[%s4043_s1 + $0x724] ss:$24 sps:$4 sm:$0xff]  }
  0x3f   :  { %658 = vmatpush1.bf16.msra.mxu0 %v2783_v33  ;;  %v2854_v33 = vld [vmem:[%s4043_s1 + $0x720] ss:$24 sps:$4 sm:$0xff]  }
  0x40   :  { %668 = vmatprep.subr.bf16.mxu0 %v2788_v34  ;;  %v2859_v34 = vld [vmem:[%s4043_s1 + $0x754] ss:$24 sps:$4 sm:$0xff]  }
  0x42   :  { %660 = vmatmul.mubr.bf16.vlgmr.msra.gmra.mrb[0].mxu0 %v2312_v36  ;;  %v2862_v36 = vld [vmem:[%s4043_s1 + $0x784] ss:$24 sps:$4 sm:$0xff]  }
  0x43   :  { %669 = vmatpush1.bf16.msra.mxu0 %v2786_v37  ;;  %700 = vmatprep.mubr.bf16.mxu0 %v2315_v38  ;;  %v2860_v37 = vld [vmem:[%s4043_s1 + $0x780] ss:$24 sps:$4 sm:$0xff]   ;;  %v2865_v38 = vld [vmem:[%s4043_s1 + $0x7b4] ss:$24 sps:$4 sm:$0xff]  }
  0x44   :  { %670 = vmatprep.subr.bf16.mxu0 %v2791_v39  ;;  %v2863_v39 = vld [vmem:[%s4043_s1 + $0x7b0] ss:$24 sps:$4 sm:$0xff]  }
  0x47   :  { %671 = vmatpush1.bf16.msra.mxu0 %v2789_v40  ;;  %v2868_v40 = vld [vmem:[%s4043_s1 + $0x7e4] ss:$24 sps:$4 sm:$0xff]  }
  0x48   :  { %672 = vmatprep.subr.bf16.mxu0 %v2794_v44  ;;  %v2874_v44 = vld [vmem:[%s4043_s1 + $0x844] ss:$24 sps:$4 sm:$0xff]  }
  0x4b   :  { %673 = vmatpush1.bf16.msra.mxu0 %v2792_v47  ;;  %v2875_v47 = vld [vmem:[%s4043_s1 + $0x870] ss:$24 sps:$4 sm:$0xff]  }
  0x4c   :  { %674 = vmatprep.subr.bf16.mxu0 %v2797_v48  ;;  %v2880_v48 = vld [vmem:[%s4043_s1 + $0x8a4] ss:$24 sps:$4 sm:$0xff]  }
  0x4f   :  { %675 = vmatpush1.bf16.msra.mxu0 %v2795_v49  ;;  %v2878_v49 = vld [vmem:[%s4043_s1 + $0x8a0] ss:$24 sps:$4 sm:$0xff]  }
  0x50   :  { %676 = vmatprep.subr.bf16.mxu0 %v2800_v52  ;;  %v2316_v52 = vcombine.low %v3393_v18, %v3393_v18  ;;  %v2909_v18 = vld [vmem:[%s4043_s1 + $0xd50] ss:$24 sps:$4 sm:$0xff]  }
  0x53   :  { %677 = vmatpush1.bf16.msra.mxu0 %v2798_v54  ;;  %v2899_v54 = vld [vmem:[%s4043_s1 + $0xa20] ss:$24 sps:$4 sm:$0xff]  }
  0x54   :  { %678 = vmatprep.subr.bf16.mxu0 %v2803_v56  ;;  %2598 = vmatpush3.bf16.msra.mxu1 %v2899_v54  ;;  %v2901_v56 = vld [vmem:[%s4043_s1 + $0xa50] ss:$24 sps:$4 sm:$0xff]  }
  0x55   :  { %2599 = vmatprep.subr.bf16.mxu1 %v2900_v55 }
  0x57   :  { %679 = vmatpush1.bf16.msra.mxu0 %v2801_v59  ;;  %v3507_v59 = vshrl.u32 %v116_v58, 7  ;;  %v2926_v58 = vld [vmem:[%s4043_s1 + $0x1080] ss:$24 sps:$4 sm:$0xff]  }
  0x58   :  { %680 = vmatprep.subr.bf16.mxu0 %v2806_v60  ;;  %2600 = vmatpush3.bf16.msra.mxu1 %v2901_v56 }
  0x59   :  { %2643 = vmatprep.subr.bf16.mxu1 %v3126_v57  ;;  %v3510_v60 = vsub.s32 0, %v3507_v59 }
  0x5b   :  { %681 = vmatpush1.bf16.msra.mxu0 %v2804_v62  ;;  %v3516_v62 = vsub.s32 1, %v3507_v59 }
  0x5c   :  { %682 = vmatprep.subr.bf16.mxu0 %v2809_v63  ;;  %v119_v63 = vrot.slane %v114_v61, %v3510_v60 }
  0x5f   :  { %683 = vmatpush1.bf16.msra.mxu0 %v2807_v0  ;;  %v123_v0 = vrot.slane %v114_v61, %v3516_v62 }
  0x60   :  { %684 = vmatprep.subr.bf16.mxu0 %v2812_v1 }
  0x63   :  { %685 = vmatpush1.bf16.msra.mxu0 %v2810_v2 }
  0x64   :  { %686 = vmatprep.subr.bf16.mxu0 %v2815_v3 }
  0x67   :  { %687 = vmatpush1.bf16.msra.mxu0 %v2813_v4 }
  0x68   :  { %688 = vmatprep.subr.bf16.mxu0 %v2818_v5 }
  0x6b   :  { %689 = vmatpush1.bf16.msra.mxu0 %v2816_v6 }
  0x6c   :  { %690 = vmatprep.subr.bf16.mxu0 %v2821_v7 }
  0x6f   :  { %691 = vmatpush1.bf16.msra.mxu0 %v2819_v8 }
  0x70   :  { %692 = vmatprep.subr.bf16.mxu0 %v2824_v9 }
  0x73   :  { %693 = vmatpush1.bf16.msra.mxu0 %v2822_v10  ;;  %v2902_v10 = vld [vmem:[%s4043_s1 + $0xc00] ss:$24 sps:$4 sm:$0xff]  }
  0x74   :  { %694 = vmatprep.subr.bf16.mxu0 %v2827_v11 }
  0x77   :  { %695 = vmatpush1.bf16.msra.mxu0 %v2825_v12  ;;  %v2903_v12 = vld [vmem:[%s4043_s1 + $0xc30] ss:$24 sps:$4 sm:$0xff]  }
  0x78   :  { %696 = vmatprep.subr.bf16.mxu0 %v2830_v13  ;;  %v2904_v13 = vld [vmem:[%s4043_s1 + $0xc60] ss:$24 sps:$4 sm:$0xff]  }
  0x7b   :  { %697 = vmatpush1.bf16.msra.mxu0 %v2828_v14  ;;  %v2905_v14 = vld [vmem:[%s4043_s1 + $0xc90] ss:$24 sps:$4 sm:$0xff]  }
  0x7c   :  { %698 = vmatprep.subr.bf16.mxu0 %v2833_v15  ;;  %v2906_v15 = vld [vmem:[%s4043_s1 + $0xcc0] ss:$24 sps:$4 sm:$0xff]  }
  0x7f   :  { %699 = vmatpush1.bf16.msra.mxu0 %v2831_v16  ;;  %v2907_v16 = vld [vmem:[%s4043_s1 + $0xcf0] ss:$24 sps:$4 sm:$0xff]  }
  0x80   :  { %709 = vmatprep.subr.bf16.mxu0 %v2838_v17  ;;  %v2908_v17 = vld [vmem:[%s4043_s1 + $0xd20] ss:$24 sps:$4 sm:$0xff]  }
  0x82   :  { %701 = vmatmul.mubr.bf16.vlgmr.msra.gmra.mrb[0].mxu0 %v2314_v20  ;;  %v2414_v20 = vld [vmem:[%s4045_s2 + $0x2] ss:$0 sm:$0xff] }
  0x83   :  { %710 = vmatpush1.bf16.msra.mxu0 %v2836_v19  ;;  %741 = vmatprep.mubr.bf16.mxu0 %v2317_v22 }
  0x84   :  { %711 = vmatprep.subr.bf16.mxu0 %v2841_v21 }
  0x87   :  { %712 = vmatpush1.bf16.msra.mxu0 %v2839_v23 }
  0x88   :  { %713 = vmatprep.subr.bf16.mxu0 %v2844_v24 }
  0x8b   :  { %714 = vmatpush1.bf16.msra.mxu0 %v2842_v25 }
  0x8c   :  { %715 = vmatprep.subr.bf16.mxu0 %v2847_v26 }
  0x8f   :  { %716 = vmatpush1.bf16.msra.mxu0 %v2845_v27  ;;  %v2910_v27 = vld [vmem:[%s4043_s1 + $0xd80] ss:$24 sps:$4 sm:$0xff]  }
  0x90   :  { %717 = vmatprep.subr.bf16.mxu0 %v2850_v28 }
  0x93   :  { %718 = vmatpush1.bf16.msra.mxu0 %v2848_v29  ;;  %v2911_v29 = vld [vmem:[%s4043_s1 + $0xdb0] ss:$24 sps:$4 sm:$0xff]  }
  0x94   :  { %719 = vmatprep.subr.bf16.mxu0 %v2853_v30  ;;  %v2912_v30 = vld [vmem:[%s4043_s1 + $0xde0] ss:$24 sps:$4 sm:$0xff]  }
  0x97   :  { %720 = vmatpush1.bf16.msra.mxu0 %v2851_v31  ;;  %v2913_v31 = vld [vmem:[%s4043_s1 + $0xe10] ss:$24 sps:$4 sm:$0xff]  }
  0x98   :  { %721 = vmatprep.subr.bf16.mxu0 %v2856_v32  ;;  %v2914_v32 = vld [vmem:[%s4043_s1 + $0xe40] ss:$24 sps:$4 sm:$0xff]  }
  0x9b   :  { %722 = vmatpush1.bf16.msra.mxu0 %v2854_v33  ;;  %v2915_v33 = vld [vmem:[%s4043_s1 + $0xe70] ss:$24 sps:$4 sm:$0xff]  }
  0x9c   :  { %723 = vmatprep.subr.bf16.mxu0 %v2859_v34  ;;  %v2916_v34 = vld [vmem:[%s4043_s1 + $0xea0] ss:$24 sps:$4 sm:$0xff]  }
  0x9f   :  { %724 = vmatpush1.bf16.msra.mxu0 %v2857_v35  ;;  %v2917_v35 = vld [vmem:[%s4043_s1 + $0xed0] ss:$24 sps:$4 sm:$0xff]  }
  0xa0   :  { %725 = vmatprep.subr.bf16.mxu0 %v2862_v36  ;;  %v2431_v36 = vld [vmem:[%s4045_s2 + $0x3] ss:$0 sm:$0xff] }
  0xa3   :  { %726 = vmatpush1.bf16.msra.mxu0 %v2860_v37 }
  0xa4   :  { %727 = vmatprep.subr.bf16.mxu0 %v2865_v38 }
  0xa7   :  { %728 = vmatpush1.bf16.msra.mxu0 %v2863_v39 }
  0xa8   :  { %729 = vmatprep.subr.bf16.mxu0 %v2868_v40 }
  0xab   :  { %730 = vmatpush1.bf16.msra.mxu0 %v2866_v41 }
  0xac   :  { %731 = vmatprep.subr.bf16.mxu0 %v2871_v42 }
  0xaf   :  { %732 = vmatpush1.bf16.msra.mxu0 %v2869_v43  ;;  %v2918_v43 = vld [vmem:[%s4043_s1 + $0xf00] ss:$24 sps:$4 sm:$0xff]  }
  0xb0   :  { %733 = vmatprep.subr.bf16.mxu0 %v2874_v44 }
  0xb3   :  { %734 = vmatpush1.bf16.msra.mxu0 %v2872_v45  ;;  %v2919_v45 = vld [vmem:[%s4043_s1 + $0xf30] ss:$24 sps:$4 sm:$0xff]  }
  0xb4   :  { %735 = vmatprep.subr.bf16.mxu0 %v2877_v46  ;;  %v2920_v46 = vld [vmem:[%s4043_s1 + $0xf60] ss:$24 sps:$4 sm:$0xff]  }
  0xb7   :  { %736 = vmatpush1.bf16.msra.mxu0 %v2875_v47  ;;  %v2921_v47 = vld [vmem:[%s4043_s1 + $0xf90] ss:$24 sps:$4 sm:$0xff]  }
  0xb8   :  { %737 = vmatprep.subr.bf16.mxu0 %v2880_v48  ;;  %v2922_v48 = vld [vmem:[%s4043_s1 + $0xfc0] ss:$24 sps:$4 sm:$0xff]  }
  0xbb   :  { %738 = vmatpush1.bf16.msra.mxu0 %v2878_v49  ;;  %v2923_v49 = vld [vmem:[%s4043_s1 + $0xff0] ss:$24 sps:$4 sm:$0xff]  }
  0xbc   :  { %739 = vmatprep.subr.bf16.mxu0 %v2883_v50  ;;  %v2924_v50 = vld [vmem:[%s4043_s1 + $0x1020] ss:$24 sps:$4 sm:$0xff]  }
  0xbf   :  { %740 = vmatpush1.bf16.msra.mxu0 %v2881_v51  ;;  %v2925_v51 = vld [vmem:[%s4043_s1 + $0x1050] ss:$24 sps:$4 sm:$0xff]  }
  0xc2   :  { %742 = vmatmul.mubr.bf16.vlgmr.msra.gmra.mrb[0].mxu0 %v2316_v52  ;;  %v2440_v52 = vld [vmem:[%s4045_s2 + $0x4] ss:$0 sm:$0xff] }
 0x195   :  { %v743_v1 = vpop.f32.mrb[0].mxu0 }
 0x196   :  { %v2723_v2 = vadd.f32 %v743_v1, %v119_v63  ;;  %v745_v3 = vpop.f32.mrb[1].mxu0  ;;  %v2928_v1 = vld [vmem:[%s4043_s1 + $0x10e0] ss:$24 sps:$4 sm:$0xff]  }
 0x197   :  { %v2724_v4 = vadd.f32 %v745_v3, %v123_v0  ;;  %v747_v5 = vpop.f32.mrb[2].mxu0  ;;  %v2927_v0 = vld [vmem:[%s4043_s1 + $0x10b0] ss:$24 sps:$4 sm:$0xff]   ;;  %v2930_v3 = vld [vmem:[%s4043_s1 + $0x1140] ss:$24 sps:$4 sm:$0xff]  }
 0x198   :  { %v750_v6 = vmax.f32 %v2723_v2, 0.0  ;;  %v748_v7 = vpop.f32.mrb[3].mxu0  ;;  %v2929_v2 = vld [vmem:[%s4043_s1 + $0x1110] ss:$24 sps:$4 sm:$0xff]   ;;  %v2932_v5 = vld [vmem:[%s4043_s1 + $0x11a0] ss:$24 sps:$4 sm:$0xff]  }
 0x199   :  { %v751_v8 = vmax.f32 %v2724_v4, 0.0  ;;  %v2931_v4 = vld [vmem:[%s4043_s1 + $0x1170] ss:$24 sps:$4 sm:$0xff]   ;;  %v2936_v7 = vld [vmem:[%s4043_s1 + $0x1204] ss:$24 sps:$4 sm:$0xff]  }
 0x19a   :  { %v752_v11 = vpack.c.bf16 %v750_v6, %v750_v6  ;;  %v2933_v6 = vld [vmem:[%s4043_s1 + $0x11d0] ss:$24 sps:$4 sm:$0xff]  }
 0x19b   :  { %v753_v9 = vpack.c.bf16 %v751_v8, %v751_v8  ;;  %v2449_v8 = vld [vmem:[%s4045_s2 + $0x5] ss:$0 sm:$0xff] }
 0x19d   :  { %921 = vmatprep.mubr.bf16.mxu1 %v753_v9 }
 0x19e   :  { %922 = vmatmul.mubr.bf16.vlgmr.msra.gmra.mrb[0].mxu1 %v752_v11 }
 0x19f   :  { %2644 = vmatpush3.bf16.msra.mxu1 %v2902_v10  ;;  %2659 = vmatprep.mubr.msk.bf16.mxu1 %vm3127_vm0, %v3126_v57 }
 0x1a0   :  { %2645 = vmatprep.subr.bf16.mxu1 %v3126_v57 }
 0x1a3   :  { %2646 = vmatpush3.bf16.msra.mxu1 %v2903_v12 }
 0x1a4   :  { %2647 = vmatprep.subr.bf16.mxu1 %v3126_v57 }
 0x1a7   :  { %2648 = vmatpush3.bf16.msra.mxu1 %v2904_v13 }
 0x1a8   :  { %2649 = vmatprep.subr.bf16.mxu1 %v3126_v57 }
 0x1ab   :  { %2650 = vmatpush3.bf16.msra.mxu1 %v2905_v14  ;;  %v2934_v14 = vld [vmem:[%s4043_s1 + $0x1200] ss:$24 sps:$4 sm:$0xff]  }
 0x1ac   :  { %2651 = vmatprep.subr.bf16.mxu1 %v3126_v57 }
 0x1af   :  { %2652 = vmatpush3.bf16.msra.mxu1 %v2906_v15 }
 0x1b0   :  { %2653 = vmatprep.subr.bf16.mxu1 %v3126_v57 }
 0x1b3   :  { %2654 = vmatpush3.bf16.msra.mxu1 %v2907_v16  ;;  %v2939_v16 = vld [vmem:[%s4043_s1 + $0x1234] ss:$24 sps:$4 sm:$0xff]  }
 0x1b4   :  { %2655 = vmatprep.subr.bf16.mxu1 %v3126_v57 }
 0x1b7   :  { %2656 = vmatpush3.bf16.msra.mxu1 %v2908_v17  ;;  %v2937_v17 = vld [vmem:[%s4043_s1 + $0x1230] ss:$24 sps:$4 sm:$0xff]  }
 0x1b8   :  { %2657 = vmatprep.subr.bf16.mxu1 %v3126_v57 }
 0x1bb   :  { %2658 = vmatpush3.bf16.msra.mxu1 %v2909_v18  ;;  %v2942_v18 = vld [vmem:[%s4043_s1 + $0x1264] ss:$24 sps:$4 sm:$0xff]  }
 0x1bc   :  { %2663 = vmatprep.subr.bf16.mxu1 %v3126_v57 }
 0x271   :  { %v2601_v19 = vpop.f32.mrb[0].mxu1 }
 0x272   :  { %v2602_v21 = vpop.f32.mrb[1].mxu1 }
 0x273   :  { %v2603_v22 = vadd.f32 %v2602_v21, %v2601_v19  ;;  %v2604_v23 = vpop.f32.mrb[2].mxu1  ;;  %v2940_v19 = vld [vmem:[%s4043_s1 + $0x1260] ss:$24 sps:$4 sm:$0xff]   ;;  %v2943_v21 = vld [vmem:[%s4043_s1 + $0x1290] ss:$24 sps:$4 sm:$0xff]  }
 0x274   :  { %v2605_v24 = vpop.f32.mrb[3].mxu1  ;;  %v2946_v23 = vld [vmem:[%s4043_s1 + $0x12c0] ss:$24 sps:$4 sm:$0xff]  }
 0x275   :  { %v924_v25 = vadd.f32 %v2603_v22, %v2414_v20  ;;  %v2945_v20 = vld [vmem:[%s4043_s1 + $0x1294] ss:$24 sps:$4 sm:$0xff]   ;;  %v2948_v22 = vld [vmem:[%s4043_s1 + $0x12c4] ss:$24 sps:$4 sm:$0xff]  }
 0x276   :  { %v2951_v24 = vld [vmem:[%s4043_s1 + $0x12f4] ss:$24 sps:$4 sm:$0xff]  }
 0x277   :  { %v929_v26 = vmax.f32 %v924_v25, 0.0  ;;  %v2949_v25 = vld [vmem:[%s4043_s1 + $0x12f0] ss:$24 sps:$4 sm:$0xff]  }
 0x279   :  { %v930_v28 = vpack.c.bf16 %v929_v26, %v929_v26  ;;  %v2954_v26 = vld [vmem:[%s4043_s1 + $0x1324] ss:$24 sps:$4 sm:$0xff]  }
 0x27b   :  { %2660 = vmatmul.mubr.bf16.vlgmr.msra.gmra.mrb[4].mxu1 %v930_v28  ;;  %v2957_v28 = vld [vmem:[%s4043_s1 + $0x1354] ss:$24 sps:$4 sm:$0xff]  }
 0x27c   :  { %2664 = vmatpush3.bf16.msra.mxu1 %v2910_v27  ;;  %2679 = vmatprep.mubr.msk.bf16.mxu1 %vm3127_vm0, %v3126_v57  ;;  %v2952_v27 = vld [vmem:[%s4043_s1 + $0x1320] ss:$24 sps:$4 sm:$0xff]  }
 0x27d   :  { %2665 = vmatprep.subr.bf16.mxu1 %v3126_v57 }
 0x280   :  { %2666 = vmatpush3.bf16.msra.mxu1 %v2911_v29  ;;  %v2955_v29 = vld [vmem:[%s4043_s1 + $0x1350] ss:$24 sps:$4 sm:$0xff]  }
 0x281   :  { %2667 = vmatprep.subr.bf16.mxu1 %v3126_v57 }
 0x284   :  { %2668 = vmatpush3.bf16.msra.mxu1 %v2912_v30  ;;  %v3128_v30 = vmov 0  }
 0x285   :  { %2669 = vmatprep.subr.bf16.mxu1 %v3126_v57 }
 0x288   :  { %2670 = vmatpush3.bf16.msra.mxu1 %v2913_v31  ;;  %v2958_v31 = vld [vmem:[%s4043_s1 + $0x1380] ss:$24 sps:$4 sm:$0xff]  }
 0x289   :  { %2671 = vmatprep.subr.bf16.mxu1 %v3126_v57 }
 0x28c   :  { %2672 = vmatpush3.bf16.msra.mxu1 %v2914_v32  ;;  %v2960_v32 = vld [vmem:[%s4043_s1 + $0x1384] ss:$24 sps:$4 sm:$0xff]  }
 0x28d   :  { %2673 = vmatprep.subr.bf16.mxu1 %v3126_v57  ;;  %2143 = vmatprep.subr.bf16.mxu0 %v2960_v32  ;;  %v3041_v32 = vld [vmem:[%s4043_s1 + $0x15fc] ss:$24 sps:$4 sm:$0xff]  }
 0x28e   :  { %2144 = vmatpush1.bf16.msra.mxu0 %v2958_v31  ;;  %v3033_v31 = vld [vmem:[%s4043_s1 + $0x15c8] ss:$24 sps:$4 sm:$0xff]  }
 0x290   :  { %2674 = vmatpush3.bf16.msra.mxu1 %v2915_v33  ;;  %v2963_v33 = vld [vmem:[%s4043_s1 + $0x138c] ss:$24 sps:$4 sm:$0xff]  }
 0x291   :  { %2675 = vmatprep.subr.bf16.mxu1 %v3126_v57 }
 0x294   :  { %2676 = vmatpush3.bf16.msra.mxu1 %v2916_v34  ;;  %v2966_v34 = vld [vmem:[%s4043_s1 + $0x13b4] ss:$24 sps:$4 sm:$0xff]  }
 0x295   :  { %2677 = vmatprep.subr.bf16.mxu1 %v3126_v57  ;;  %2145 = vmatprep.subr.bf16.mxu0 %v2966_v34  ;;  %v3044_v34 = vld [vmem:[%s4043_s1 + $0x1624] ss:$24 sps:$4 sm:$0xff]  }
 0x298   :  { %2678 = vmatpush3.bf16.msra.mxu1 %v2917_v35  ;;  %v2964_v35 = vld [vmem:[%s4043_s1 + $0x13b0] ss:$24 sps:$4 sm:$0xff]  }
 0x299   :  { %2683 = vmatprep.subr.bf16.mxu1 %v3126_v57  ;;  %2146 = vmatpush1.bf16.msra.mxu0 %v2964_v35  ;;  %v3042_v35 = vld [vmem:[%s4043_s1 + $0x1620] ss:$24 sps:$4 sm:$0xff]  }
 0x34e   :  { %v1036_v37 = vpop.f32.mrb[4].mxu1 }
 0x34f   :  { %v1037_v38 = vadd.f32 %v2431_v36, %v1036_v37  ;;  %v2661_v39 = vpop.f32.mrb[5].mxu1  ;;  %v2972_v36 = vld [vmem:[%s4043_s1 + $0x13e4] ss:$24 sps:$4 sm:$0xff]   ;;  %v2970_v37 = vld [vmem:[%s4043_s1 + $0x13e0] ss:$24 sps:$4 sm:$0xff]  }
 0x350   :  { %v1039_v40 = vpop.f32.mrb[6].mxu1  ;;  %2147 = vmatprep.subr.bf16.mxu0 %v2972_v36  ;;  %v2976_v39 = vld [vmem:[%s4043_s1 + $0x1410] ss:$24 sps:$4 sm:$0xff]   ;;  %v3047_v36 = vld [vmem:[%s4043_s1 + $0x162c] ss:$24 sps:$4 sm:$0xff]  }
 0x351   :  { %v1042_v41 = vmax.f32 %v1037_v38, 0.0  ;;  %v2662_v42 = vpop.f32.mrb[7].mxu1  ;;  %v2978_v38 = vld [vmem:[%s4043_s1 + $0x1414] ss:$24 sps:$4 sm:$0xff]   ;;  %2148 = vmatpush1.bf16.msra.mxu0 %v2970_v37  ;;  %v2984_v40 = vld [vmem:[%s4043_s1 + $0x1444] ss:$24 sps:$4 sm:$0xff]  }
 0x352   :  { %2149 = vmatprep.subr.bf16.mxu0 %v2978_v38  ;;  %v2990_v42 = vld [vmem:[%s4043_s1 + $0x1474] ss:$24 sps:$4 sm:$0xff]   ;;  %v3045_v37 = vld [vmem:[%s4043_s1 + $0x1628] ss:$24 sps:$4 sm:$0xff]  }
 0x353   :  { %v1043_v44 = vpack.c.bf16 %v1042_v41, %v1042_v41  ;;  %v2982_v41 = vld [vmem:[%s4043_s1 + $0x1440] ss:$24 sps:$4 sm:$0xff]   ;;  %v3050_v38 = vld [vmem:[%s4043_s1 + $0x1654] ss:$24 sps:$4 sm:$0xff]  }
 0x355   :  { %2680 = vmatmul.mubr.bf16.vlgmr.msra.gmra.mrb[8].mxu1 %v1043_v44  ;;  %2150 = vmatpush1.bf16.msra.mxu0 %v2976_v39  ;;  %v2996_v44 = vld [vmem:[%s4043_s1 + $0x14a4] ss:$24 sps:$4 sm:$0xff]   ;;  %v3048_v39 = vld [vmem:[%s4043_s1 + $0x1650] ss:$24 sps:$4 sm:$0xff]  }
 0x356   :  { %2684 = vmatpush3.bf16.msra.mxu1 %v2918_v43  ;;  %2699 = vmatprep.mubr.msk.bf16.mxu1 %vm3127_vm0, %v3126_v57  ;;  %v2988_v43 = vld [vmem:[%s4043_s1 + $0x1470] ss:$24 sps:$4 sm:$0xff]  }
 0x357   :  { %2685 = vmatprep.subr.bf16.mxu1 %v3126_v57  ;;  %2151 = vmatprep.subr.bf16.mxu0 %v2984_v40  ;;  %v3053_v40 = vld [vmem:[%s4043_s1 + $0x165c] ss:$24 sps:$4 sm:$0xff]  }
 0x359   :  { %2152 = vmatpush1.bf16.msra.mxu0 %v2982_v41  ;;  %v3051_v41 = vld [vmem:[%s4043_s1 + $0x1658] ss:$24 sps:$4 sm:$0xff]  }
 0x35a   :  { %2686 = vmatpush3.bf16.msra.mxu1 %v2919_v45  ;;  %2153 = vmatprep.subr.bf16.mxu0 %v2990_v42  ;;  %v2994_v45 = vld [vmem:[%s4043_s1 + $0x14a0] ss:$24 sps:$4 sm:$0xff]   ;;  %v3056_v42 = vld [vmem:[%s4043_s1 + $0x1394] ss:$24 sps:$4 sm:$0xff]  }
 0x35b   :  { %2687 = vmatprep.subr.bf16.mxu1 %v3126_v57 }
 0x35d   :  { %2154 = vmatpush1.bf16.msra.mxu0 %v2988_v43  ;;  %v1398_v43 = vld [vmem:[%s4045_s2 + $0x7] sm:$0x3] }
 0x35e   :  { %2688 = vmatpush3.bf16.msra.mxu1 %v2920_v46  ;;  %2155 = vmatprep.subr.bf16.mxu0 %v2996_v44  ;;  %v3002_v46 = vld [vmem:[%s4043_s1 + $0x14d4] ss:$24 sps:$4 sm:$0xff]   ;;  %v1403_v44 = vrot.slane %v1398_v43, %v3510_v60 }
 0x35f   :  { %2689 = vmatprep.subr.bf16.mxu1 %v3126_v57 }
 0x361   :  { %2156 = vmatpush1.bf16.msra.mxu0 %v2994_v45  ;;  %v1407_v45 = vrot.slane %v1398_v43, %v3516_v62 }
 0x362   :  { %2690 = vmatpush3.bf16.msra.mxu1 %v2921_v47  ;;  %v3000_v47 = vld [vmem:[%s4043_s1 + $0x14d0] ss:$24 sps:$4 sm:$0xff]   ;;  %2157 = vmatprep.subr.bf16.mxu0 %v3002_v46 }
 0x363   :  { %2691 = vmatprep.subr.bf16.mxu1 %v3126_v57 }
 0x365   :  { %2158 = vmatpush1.bf16.msra.mxu0 %v3000_v47 }
 0x366   :  { %2692 = vmatpush3.bf16.msra.mxu1 %v2922_v48  ;;  %v3008_v48 = vld [vmem:[%s4043_s1 + $0x1504] ss:$24 sps:$4 sm:$0xff]  }
 0x367   :  { %2693 = vmatprep.subr.bf16.mxu1 %v3126_v57  ;;  %2159 = vmatprep.subr.bf16.mxu0 %v3008_v48 }
 0x36a   :  { %2694 = vmatpush3.bf16.msra.mxu1 %v2923_v49  ;;  %v3006_v49 = vld [vmem:[%s4043_s1 + $0x1500] ss:$24 sps:$4 sm:$0xff]  }
 0x36b   :  { %2695 = vmatprep.subr.bf16.mxu1 %v3126_v57  ;;  %2160 = vmatpush1.bf16.msra.mxu0 %v3006_v49 }
 0x36e   :  { %2696 = vmatpush3.bf16.msra.mxu1 %v2924_v50  ;;  %v3014_v50 = vld [vmem:[%s4043_s1 + $0x1534] ss:$24 sps:$4 sm:$0xff]  }
 0x36f   :  { %2697 = vmatprep.subr.bf16.mxu1 %v3126_v57  ;;  %2161 = vmatprep.subr.bf16.mxu0 %v3014_v50 }
 0x372   :  { %2698 = vmatpush3.bf16.msra.mxu1 %v2925_v51  ;;  %v3012_v51 = vld [vmem:[%s4043_s1 + $0x1530] ss:$24 sps:$4 sm:$0xff]  }
 0x373   :  { %2703 = vmatprep.subr.bf16.mxu1 %v3126_v57  ;;  %2162 = vmatpush1.bf16.msra.mxu0 %v3012_v51 }
 0x428   :  { %v1149_v53 = vpop.f32.mrb[8].mxu1 }
 0x429   :  { %v1150_v54 = vadd.f32 %v2440_v52, %v1149_v53  ;;  %v2681_v55 = vpop.f32.mrb[9].mxu1  ;;  %v3020_v52 = vld [vmem:[%s4043_s1 + $0x1564] ss:$24 sps:$4 sm:$0xff]   ;;  %v3018_v53 = vld [vmem:[%s4043_s1 + $0x1560] ss:$24 sps:$4 sm:$0xff]  }
 0x42a   :  { %v1152_v56 = vpop.f32.mrb[10].mxu1  ;;  %2163 = vmatprep.subr.bf16.mxu0 %v3020_v52  ;;  %v3024_v55 = vld [vmem:[%s4043_s1 + $0x1590] ss:$24 sps:$4 sm:$0xff]  }
 0x42b   :  { %v1155_v61 = vpack.c.bf16 %v1150_v54, %v1150_v54  ;;  %v2682_v63 = vpop.f32.mrb[11].mxu1  ;;  %v3026_v54 = vld [vmem:[%s4043_s1 + $0x1594] ss:$24 sps:$4 sm:$0xff]   ;;  %2164 = vmatpush1.bf16.msra.mxu0 %v3018_v53  ;;  %v3032_v56 = vld [vmem:[%s4043_s1 + $0x15c4] ss:$24 sps:$4 sm:$0xff]  }
 0x42c   :  { %2165 = vmatprep.subr.bf16.mxu0 %v3026_v54  ;;  %v3036_v63 = vld [vmem:[%s4043_s1 + $0x15f0] ss:$24 sps:$4 sm:$0xff]  }
 0x42d   :  { %2700 = vmatmul.mubr.bf16.vlgmr.msra.gmra.mrb[12].mxu1 %v1155_v61  ;;  %v3038_v61 = vld [vmem:[%s4043_s1 + $0x15f4] ss:$24 sps:$4 sm:$0xff]  }
 0x42e   :  { %2704 = vmatpush3.bf16.msra.mxu1 %v2926_v58  ;;  %2719 = vmatprep.mubr.msk.bf16.mxu1 %vm3127_vm0, %v3126_v57  ;;  %v3030_v58 = vld [vmem:[%s4043_s1 + $0x15c0] ss:$24 sps:$4 sm:$0xff]  }
 0x42f   :  { %2705 = vmatprep.subr.bf16.mxu1 %v3126_v57  ;;  %2166 = vmatpush1.bf16.msra.mxu0 %v3024_v55  ;;  %v3054_v55 = vld [vmem:[%s4043_s1 + $0x1390] ss:$24 sps:$4 sm:$0xff]  }
 0x430   :  { %2167 = vmatprep.subr.bf16.mxu0 %v3032_v56 }
 0x432   :  { %2706 = vmatpush3.bf16.msra.mxu1 %v2927_v0  ;;  %v2458_v0 = vld [vmem:[%s4045_s2 + $0x6] ss:$0 sm:$0xff] }
 0x433   :  { %2707 = vmatprep.subr.bf16.mxu1 %v3126_v57  ;;  %2168 = vmatpush1.bf16.msra.mxu0 %v3030_v58  ;;  %v3059_v58 = vld [vmem:[%s4043_s1 + $0x13c4] ss:$24 sps:$4 sm:$0xff]  }
 0x434   :  { %2169 = vmatprep.subr.bf16.mxu0 %v3038_v61  ;;  %v3057_v61 = vld [vmem:[%s4043_s1 + $0x13c0] ss:$24 sps:$4 sm:$0xff]  }
 0x436   :  { %2708 = vmatpush3.bf16.msra.mxu1 %v2928_v1 }
 0x437   :  { %2709 = vmatprep.subr.bf16.mxu1 %v3126_v57  ;;  %2170 = vmatpush1.bf16.msra.mxu0 %v3036_v63  ;;  %v3062_v63 = vld [vmem:[%s4043_s1 + $0x13f4] ss:$24 sps:$4 sm:$0xff]  }
 0x438   :  { %2171 = vmatprep.subr.bf16.mxu0 %v3044_v34 }
 0x43a   :  { %2710 = vmatpush3.bf16.msra.mxu1 %v2929_v2 }
 0x43b   :  { %2711 = vmatprep.subr.bf16.mxu1 %v3126_v57  ;;  %2172 = vmatpush1.bf16.msra.mxu0 %v3042_v35 }
 0x43c   :  { %2173 = vmatprep.subr.bf16.mxu0 %v3050_v38 }
 0x43e   :  { %2712 = vmatpush3.bf16.msra.mxu1 %v2930_v3 }
 0x43f   :  { %2713 = vmatprep.subr.bf16.mxu1 %v3126_v57  ;;  %2174 = vmatpush1.bf16.msra.mxu0 %v3048_v39 }
 0x440   :  { %2225 = vmatprep.subr.bf16.mxu0 %v3056_v42 }
 0x442   :  { %2714 = vmatpush3.bf16.msra.mxu1 %v2931_v4 }
 0x443   :  { %2715 = vmatprep.subr.bf16.mxu1 %v3126_v57 }
 0x446   :  { %2716 = vmatpush3.bf16.msra.mxu1 %v2932_v5 }
 0x447   :  { %2717 = vmatprep.subr.bf16.mxu1 %v3126_v57 }
 0x44a   :  { %2718 = vmatpush3.bf16.msra.mxu1 %v2933_v6 }
 0x44b   :  { %1490 = vmatprep.subr.bf16.mxu1 %v2936_v7  ;;  %v2961_v7 = vld [vmem:[%s4043_s1 + $0x1388] ss:$24 sps:$4 sm:$0xff]  }
 0x500   :  { %v1261_v9 = vpop.f32.mrb[12].mxu1 }
 0x501   :  { %v1262_v10 = vadd.f32 %v2449_v8, %v1261_v9  ;;  %v2701_v11 = vpop.f32.mrb[13].mxu1  ;;  %v2969_v9 = vld [vmem:[%s4043_s1 + $0x13bc] ss:$24 sps:$4 sm:$0xff]  }
 0x502   :  { %v1264_v12 = vpop.f32.mrb[14].mxu1  ;;  %v2975_v11 = vld [vmem:[%s4043_s1 + $0x13ec] ss:$24 sps:$4 sm:$0xff]  }
 0x503   :  { %v1267_v13 = vmax.f32 %v1262_v10, 0.0  ;;  %v2702_v57 = vpop.f32.mrb[15].mxu1  ;;  %v2967_v10 = vld [vmem:[%s4043_s1 + $0x13b8] ss:$24 sps:$4 sm:$0xff]   ;;  %v2973_v12 = vld [vmem:[%s4043_s1 + $0x13e8] ss:$24 sps:$4 sm:$0xff]  }
 0x504   :  { %v2979_v57 = vld [vmem:[%s4043_s1 + $0x1418] ss:$24 sps:$4 sm:$0xff]  }
 0x505   :  { %v1268_v15 = vpack.c.bf16 %v1267_v13, %v1267_v13  ;;  %v2981_v13 = vld [vmem:[%s4043_s1 + $0x141c] ss:$24 sps:$4 sm:$0xff]  }
 0x507   :  { %2720 = vmatmul.mubr.bf16.vlgmr.msra.gmra.mrb[16].mxu1 %v1268_v15  ;;  %v2985_v15 = vld [vmem:[%s4043_s1 + $0x1448] ss:$24 sps:$4 sm:$0xff]  }
 0x508   :  { %1491 = vmatpush1.bf16.msra.mxu1 %v2934_v14  ;;  %1522 = vmatprep.mubr.bf16.mxu1 %v3128_v30  ;;  %v2987_v14 = vld [vmem:[%s4043_s1 + $0x144c] ss:$24 sps:$4 sm:$0xff]  }
 0x509   :  { %1492 = vmatprep.subr.bf16.mxu1 %v2939_v16  ;;  %v2993_v16 = vld [vmem:[%s4043_s1 + $0x147c] ss:$24 sps:$4 sm:$0xff]   ;;  %v3035_v30 = vld [vmem:[%s4043_s1 + $0x15cc] ss:$24 sps:$4 sm:$0xff]  }
 0x50c   :  { %1493 = vmatpush1.bf16.msra.mxu1 %v2937_v17  ;;  %v2991_v17 = vld [vmem:[%s4043_s1 + $0x1478] ss:$24 sps:$4 sm:$0xff]  }
 0x50d   :  { %1494 = vmatprep.subr.bf16.mxu1 %v2942_v18  ;;  %v2999_v18 = vld [vmem:[%s4043_s1 + $0x14ac] ss:$24 sps:$4 sm:$0xff]  }
 0x510   :  { %1495 = vmatpush1.bf16.msra.mxu1 %v2940_v19  ;;  %v2997_v19 = vld [vmem:[%s4043_s1 + $0x14a8] ss:$24 sps:$4 sm:$0xff]  }
 0x511   :  { %1496 = vmatprep.subr.bf16.mxu1 %v2945_v20  ;;  %v3005_v20 = vld [vmem:[%s4043_s1 + $0x14dc] ss:$24 sps:$4 sm:$0xff]  }
 0x514   :  { %1497 = vmatpush1.bf16.msra.mxu1 %v2943_v21  ;;  %v3003_v21 = vld [vmem:[%s4043_s1 + $0x14d8] ss:$24 sps:$4 sm:$0xff]  }
 0x515   :  { %1498 = vmatprep.subr.bf16.mxu1 %v2948_v22  ;;  %v3011_v22 = vld [vmem:[%s4043_s1 + $0x150c] ss:$24 sps:$4 sm:$0xff]  }
 0x518   :  { %1499 = vmatpush1.bf16.msra.mxu1 %v2946_v23  ;;  %v3009_v23 = vld [vmem:[%s4043_s1 + $0x1508] ss:$24 sps:$4 sm:$0xff]  }
 0x519   :  { %1500 = vmatprep.subr.bf16.mxu1 %v2951_v24  ;;  %v3017_v24 = vld [vmem:[%s4043_s1 + $0x153c] ss:$24 sps:$4 sm:$0xff]  }
 0x51c   :  { %1501 = vmatpush1.bf16.msra.mxu1 %v2949_v25  ;;  %v3015_v25 = vld [vmem:[%s4043_s1 + $0x1538] ss:$24 sps:$4 sm:$0xff]  }
 0x51d   :  { %1502 = vmatprep.subr.bf16.mxu1 %v2954_v26  ;;  %v3023_v26 = vld [vmem:[%s4043_s1 + $0x156c] ss:$24 sps:$4 sm:$0xff]  }
 0x520   :  { %1503 = vmatpush1.bf16.msra.mxu1 %v2952_v27  ;;  %v3021_v27 = vld [vmem:[%s4043_s1 + $0x1568] ss:$24 sps:$4 sm:$0xff]  }
 0x521   :  { %1504 = vmatprep.subr.bf16.mxu1 %v2957_v28  ;;  %v3029_v28 = vld [vmem:[%s4043_s1 + $0x159c] ss:$24 sps:$4 sm:$0xff]  }
 0x524   :  { %1505 = vmatpush1.bf16.msra.mxu1 %v2955_v29  ;;  %v3027_v29 = vld [vmem:[%s4043_s1 + $0x1598] ss:$24 sps:$4 sm:$0xff]  }
 0x525   :  { %2184 = vmatprep.subr.bf16.mxu1 %v2963_v33  ;;  %v3039_v33 = vld [vmem:[%s4043_s1 + $0x15f8] ss:$24 sps:$4 sm:$0xff]  }
 0x5da   :  { %v1374_v1 = vpop.f32.mrb[16].mxu1 }
 0x5db   :  { %v1375_v2 = vadd.f32 %v2458_v0, %v1374_v1  ;;  %v2721_v3 = vpop.f32.mrb[17].mxu1  ;;  %v3060_v0 = vld [vmem:[%s4043_s1 + $0x13f0] ss:$24 sps:$4 sm:$0xff]   ;;  %v3065_v1 = vld [vmem:[%s4043_s1 + $0x1424] ss:$24 sps:$4 sm:$0xff]  }
 0x5dc   :  { %v1377_v4 = vpop.f32.mrb[18].mxu1  ;;  %v3068_v3 = vld [vmem:[%s4043_s1 + $0x1454] ss:$24 sps:$4 sm:$0xff]  }
 0x5dd   :  { %v1380_v5 = vmax.f32 %v1375_v2, 0.0  ;;  %v2722_v6 = vpop.f32.mrb[19].mxu1  ;;  %v3063_v2 = vld [vmem:[%s4043_s1 + $0x1420] ss:$24 sps:$4 sm:$0xff]   ;;  %v3066_v4 = vld [vmem:[%s4043_s1 + $0x1450] ss:$24 sps:$4 sm:$0xff]  }
 0x5de   :  { %v3069_v6 = vld [vmem:[%s4043_s1 + $0x1480] ss:$24 sps:$4 sm:$0xff]  }
 0x5df   :  { %v1381_v8 = vpack.c.bf16 %v1380_v5, %v1380_v5  ;;  %v3071_v5 = vld [vmem:[%s4043_s1 + $0x1484] ss:$24 sps:$4 sm:$0xff]  }
 0x5e1   :  { %1523 = vmatmul.mubr.bf16.vlgmr.msra.gmra.mrb[20].mxu1 %v1381_v8  ;;  %v3072_v8 = vld [vmem:[%s4043_s1 + $0x14b0] ss:$24 sps:$4 sm:$0xff]  }
 0x5e2   :  { %2185 = vmatpush1.bf16.msra.mxu1 %v2961_v7  ;;  %v3074_v7 = vld [vmem:[%s4043_s1 + $0x14b4] ss:$24 sps:$4 sm:$0xff]  }
 0x5e3   :  { %2186 = vmatprep.subr.bf16.mxu1 %v2969_v9  ;;  %v3077_v9 = vld [vmem:[%s4043_s1 + $0x14e4] ss:$24 sps:$4 sm:$0xff]  }
 0x5e6   :  { %2187 = vmatpush1.bf16.msra.mxu1 %v2967_v10  ;;  %v3075_v10 = vld [vmem:[%s4043_s1 + $0x14e0] ss:$24 sps:$4 sm:$0xff]  }
 0x5e7   :  { %2188 = vmatprep.subr.bf16.mxu1 %v2975_v11  ;;  %v3080_v11 = vld [vmem:[%s4043_s1 + $0x1514] ss:$24 sps:$4 sm:$0xff]  }
 0x5ea   :  { %2189 = vmatpush1.bf16.msra.mxu1 %v2973_v12  ;;  %v3078_v12 = vld [vmem:[%s4043_s1 + $0x1510] ss:$24 sps:$4 sm:$0xff]  }
 0x5eb   :  { %2190 = vmatprep.subr.bf16.mxu1 %v2981_v13  ;;  %v3083_v13 = vld [vmem:[%s4043_s1 + $0x1544] ss:$24 sps:$4 sm:$0xff]  }
 0x5ee   :  { %2191 = vmatpush1.bf16.msra.mxu1 %v2979_v57  ;;  %v3081_v57 = vld [vmem:[%s4043_s1 + $0x1540] ss:$24 sps:$4 sm:$0xff]  }
 0x5ef   :  { %2192 = vmatprep.subr.bf16.mxu1 %v2987_v14  ;;  %v3086_v14 = vld [vmem:[%s4043_s1 + $0x1574] ss:$24 sps:$4 sm:$0xff]  }
 0x5f2   :  { %2193 = vmatpush1.bf16.msra.mxu1 %v2985_v15  ;;  %v3084_v15 = vld [vmem:[%s4043_s1 + $0x1570] ss:$24 sps:$4 sm:$0xff]  }
 0x5f3   :  { %2194 = vmatprep.subr.bf16.mxu1 %v2993_v16  ;;  %v3089_v16 = vld [vmem:[%s4043_s1 + $0x15a4] ss:$24 sps:$4 sm:$0xff]  }
 0x5f6   :  { %2195 = vmatpush1.bf16.msra.mxu1 %v2991_v17  ;;  %v3087_v17 = vld [vmem:[%s4043_s1 + $0x15a0] ss:$24 sps:$4 sm:$0xff]  }
 0x5f7   :  { %2196 = vmatprep.subr.bf16.mxu1 %v2999_v18  ;;  %v3092_v18 = vld [vmem:[%s4043_s1 + $0x15d4] ss:$24 sps:$4 sm:$0xff]  }
 0x5fa   :  { %2197 = vmatpush1.bf16.msra.mxu1 %v2997_v19  ;;  %v3090_v19 = vld [vmem:[%s4043_s1 + $0x15d0] ss:$24 sps:$4 sm:$0xff]  }
 0x5fb   :  { %2198 = vmatprep.subr.bf16.mxu1 %v3005_v20  ;;  %v3095_v20 = vld [vmem:[%s4043_s1 + $0x1604] ss:$24 sps:$4 sm:$0xff]  }
 0x5fe   :  { %2199 = vmatpush1.bf16.msra.mxu1 %v3003_v21  ;;  %v3093_v21 = vld [vmem:[%s4043_s1 + $0x1600] ss:$24 sps:$4 sm:$0xff]  }
 0x5ff   :  { %2200 = vmatprep.subr.bf16.mxu1 %v3011_v22  ;;  %v3098_v22 = vld [vmem:[%s4043_s1 + $0x1634] ss:$24 sps:$4 sm:$0xff]  }
 0x602   :  { %2201 = vmatpush1.bf16.msra.mxu1 %v3009_v23  ;;  %v3096_v23 = vld [vmem:[%s4043_s1 + $0x1630] ss:$24 sps:$4 sm:$0xff]  }
 0x603   :  { %2202 = vmatprep.subr.bf16.mxu1 %v3017_v24  ;;  %v3101_v24 = vld [vmem:[%s4043_s1 + $0x1664] ss:$24 sps:$4 sm:$0xff]  }
 0x606   :  { %2203 = vmatpush1.bf16.msra.mxu1 %v3015_v25  ;;  %v3099_v25 = vld [vmem:[%s4043_s1 + $0x1660] ss:$24 sps:$4 sm:$0xff]  }
 0x607   :  { %2204 = vmatprep.subr.bf16.mxu1 %v3023_v26  ;;  %v1643_v26 = vsub.s32 2, %v3507_v59 }
 0x60a   :  { %2205 = vmatpush1.bf16.msra.mxu1 %v3021_v27  ;;  %v1631_v27 = vld [vmem:[%s4045_s2 + $0x9] sm:$0x3f] }
 0x60b   :  { %2206 = vmatprep.subr.bf16.mxu1 %v3029_v28  ;;  %v1647_v28 = vsub.s32 3, %v3507_v59 }
 0x60e   :  { %2207 = vmatpush1.bf16.msra.mxu1 %v3027_v29  ;;  %v1636_v29 = vrot.slane %v1631_v27, %v3510_v60 }
 0x60f   :  { %2208 = vmatprep.subr.bf16.mxu1 %v3035_v30  ;;  %v1644_v30 = vrot.slane %v1631_v27, %v1643_v26 }
 0x612   :  { %2209 = vmatpush1.bf16.msra.mxu1 %v3033_v31  ;;  %v1640_v31 = vrot.slane %v1631_v27, %v3516_v62 }
 0x613   :  { %2210 = vmatprep.subr.bf16.mxu1 %v3041_v32  ;;  %v1648_v32 = vrot.slane %v1631_v27, %v1647_v28 }
 0x616   :  { %2211 = vmatpush1.bf16.msra.mxu1 %v3039_v33 }
 0x617   :  { %2212 = vmatprep.subr.bf16.mxu1 %v3047_v36 }
 0x61a   :  { %2213 = vmatpush1.bf16.msra.mxu1 %v3045_v37 }
 0x61b   :  { %2214 = vmatprep.subr.bf16.mxu1 %v3053_v40 }
 0x61e   :  { %2215 = vmatpush1.bf16.msra.mxu1 %v3051_v41 }
 0x6b4   :  { %v1524_v46 = vpop.f32.mrb[20].mxu1 }
 0x6b5   :  { %v1525_v47 = vadd.f32 %v1524_v46, %v1403_v44  ;;  %v1526_v48 = vpop.f32.mrb[21].mxu1 }
 0x6b6   :  { %v1527_v49 = vadd.f32 %v1526_v48, %v1407_v45  ;;  %v1528_v50 = vpop.f32.mrb[22].mxu1 }
 0x6b7   :  { %v1531_v51 = vmax.f32 %v1525_v47, 0.0  ;;  %v1529_v52 = vpop.f32.mrb[23].mxu1 }
 0x6b8   :  { %v1532_v53 = vmax.f32 %v1527_v49, 0.0 }
 0x6b9   :  { %v3921_v56 = vpack.c.bf16 %v1531_v51, %v1531_v51 }
 0x6ba   :  { %v1534_v54 = vpack.c.bf16 %v1532_v53, %v1532_v53 }
 0x6bc   :  { %2175 = vmatprep.mubr.bf16.mxu0 %v1534_v54  ;;  %2216 = vmatprep.mubr.bf16.mxu1 %v1534_v54 }
 0x6bd   :  { %2176 = vmatmul.mubr.bf16.vlgmr.msra.gmra.mrb[4].mxu0 %v3921_v56  ;;  %2217 = vmatmul.mubr.bf16.vlgmr.msra.gmra.mrb[24].mxu1 %v3921_v56 }
 0x6be   :  { %2226 = vmatpush1.bf16.msra.mxu0 %v3054_v55  ;;  %2257 = vmatprep.mubr.bf16.mxu0 %v1534_v54 }
 0x6bf   :  { %2227 = vmatprep.subr.bf16.mxu0 %v3059_v58 }
 0x6c2   :  { %2228 = vmatpush1.bf16.msra.mxu0 %v3057_v61 }
 0x6c3   :  { %2229 = vmatprep.subr.bf16.mxu0 %v3062_v63  ;;  %v1651_v63 = vsub.s32 4, %v3507_v59 }
 0x6c6   :  { %2230 = vmatpush1.bf16.msra.mxu0 %v3060_v0  ;;  %v1655_v0 = vsub.s32 5, %v3507_v59 }
 0x6c7   :  { %2231 = vmatprep.subr.bf16.mxu0 %v3065_v1  ;;  %v1652_v1 = vrot.slane %v1631_v27, %v1651_v63 }
 0x6ca   :  { %2232 = vmatpush1.bf16.msra.mxu0 %v3063_v2  ;;  %v1656_v2 = vrot.slane %v1631_v27, %v1655_v0 }
 0x6cb   :  { %2233 = vmatprep.subr.bf16.mxu0 %v3068_v3 }
 0x6ce   :  { %2234 = vmatpush1.bf16.msra.mxu0 %v3066_v4 }
 0x6cf   :  { %2235 = vmatprep.subr.bf16.mxu0 %v3071_v5 }
 0x6d2   :  { %2236 = vmatpush1.bf16.msra.mxu0 %v3069_v6 }
 0x6d3   :  { %2237 = vmatprep.subr.bf16.mxu0 %v3074_v7 }
 0x6d6   :  { %2238 = vmatpush1.bf16.msra.mxu0 %v3072_v8 }
 0x6d7   :  { %2239 = vmatprep.subr.bf16.mxu0 %v3077_v9 }
 0x6da   :  { %2240 = vmatpush1.bf16.msra.mxu0 %v3075_v10 }
 0x6db   :  { %2241 = vmatprep.subr.bf16.mxu0 %v3080_v11 }
 0x6de   :  { %2242 = vmatpush1.bf16.msra.mxu0 %v3078_v12 }
 0x6df   :  { %2243 = vmatprep.subr.bf16.mxu0 %v3083_v13 }
 0x6e2   :  { %2244 = vmatpush1.bf16.msra.mxu0 %v3081_v57 }
 0x6e3   :  { %2245 = vmatprep.subr.bf16.mxu0 %v3086_v14 }
 0x6e6   :  { %2246 = vmatpush1.bf16.msra.mxu0 %v3084_v15 }
 0x6e7   :  { %2247 = vmatprep.subr.bf16.mxu0 %v3089_v16 }
 0x6ea   :  { %2248 = vmatpush1.bf16.msra.mxu0 %v3087_v17 }
 0x6eb   :  { %2249 = vmatprep.subr.bf16.mxu0 %v3092_v18 }
 0x6ee   :  { %2250 = vmatpush1.bf16.msra.mxu0 %v3090_v19 }
 0x6ef   :  { %2251 = vmatprep.subr.bf16.mxu0 %v3095_v20 }
 0x6f2   :  { %2252 = vmatpush1.bf16.msra.mxu0 %v3093_v21 }
 0x6f3   :  { %2253 = vmatprep.subr.bf16.mxu0 %v3098_v22 }
 0x6f6   :  { %2254 = vmatpush1.bf16.msra.mxu0 %v3096_v23 }
 0x6f7   :  { %2255 = vmatprep.subr.bf16.mxu0 %v3101_v24 }
 0x6fa   :  { %2256 = vmatpush1.bf16.msra.mxu0 %v3099_v25 }
 0x6fd   :  { %2258 = vmatmul.mubr.bf16.vlgmr.msra.gmra.mrb[8].mxu0 %v3921_v56 }
 0x790   :  { %v2177_v33 = vpop.f32.mrb[4].mxu0  ;;  %v2218_v34 = vpop.f32.mrb[24].mxu1 }
 0x791   :  { %v2178_v35 = vadd.f32 %v2177_v33, %v1636_v29  ;;  %v2219_v36 = vadd.f32 %v2218_v34, %v1644_v30  ;;  %v2179_v37 = vpop.f32.mrb[5].mxu0  ;;  %v2220_v38 = vpop.f32.mrb[25].mxu1 }
 0x792   :  { %v2180_v39 = vadd.f32 %v2179_v37, %v1640_v31  ;;  %v2221_v40 = vadd.f32 %v2220_v38, %v1648_v32  ;;  %v2181_v41 = vpop.f32.mrb[6].mxu0  ;;  %v2222_v42 = vpop.f32.mrb[26].mxu1 }
 0x793   :  { %v2579_v43 = vmul.f32 -1.442695, %v2178_v35  ;;  %v2581_v44 = vmul.f32 -1.442695, %v2219_v36  ;;  %v2182_v45 = vpop.f32.mrb[7].mxu0  ;;  %v2223_v46 = vpop.f32.mrb[27].mxu1 }
 0x794   :  { %v2580_v47 = vmul.f32 -1.442695, %v2180_v39  ;;  %v2582_v60 = vmul.f32 -1.442695, %v2221_v40 }
 0x795   :  { %3102 = vpow2.f32 %v2579_v43 }
 0x796   :  { %3104 = vpow2.f32 %v2581_v44 }
 0x797   :  { %3106 = vpow2.f32 %v2580_v47 }
 0x798   :  { %3108 = vpow2.f32 %v2582_v60 }
 0x79f   :  { %v3103_v62 = vpop.eup %3102 }
 0x7a0   :  { %v3105_v48 = vpop.eup %3104  ;;  %v2284_v49 = vadd.f32 1.0, %v3103_v62 }
 0x7a1   :  { %v3107_v50 = vpop.eup %3106  ;;  %v2286_v51 = vadd.f32 1.0, %v3105_v48 }
 0x7a2   :  { %v3109_v52 = vpop.eup %3108  ;;  %3110 = vrcp.f32 %v2284_v49  ;;  %v2285_v53 = vadd.f32 1.0, %v3107_v50 }
 0x7a3   :  { %3112 = vrcp.f32 %v2286_v51  ;;  %v2287_v54 = vadd.f32 1.0, %v3109_v52 }
 0x7a4   :  { %3114 = vrcp.f32 %v2285_v53 }
 0x7a5   :  { %3116 = vrcp.f32 %v2287_v54 }
 0x7ac   :  { %v3111_v55 = vpop.eup %3110 }
 0x7ad   :  { %v3113_v56 = vpop.eup %3112  ;;  %2302 = vst [vmem:[%s4046_s3] sm:$0xff] %v3111_v55 }
 0x7ae   :  { %v3115_v58 = vpop.eup %3114  ;;  %2304 = vst [vmem:[%s4046_s3 + $0x10] sm:$0xff] %v3113_v56 }
 0x7af   :  { %v3117_v61 = vpop.eup %3116  ;;  %2303 = vst [vmem:[%s4046_s3 + $0x8] sm:$0xff] %v3115_v58 }
 0x7b0   :  { %2305 = vst [vmem:[%s4046_s3 + $0x18] sm:$0xff] %v3117_v61 }
 0x7d0   :  { %v2259_v3 = vpop.f32.mrb[8].mxu0 }
 0x7d1   :  { %v2260_v4 = vadd.f32 %v2259_v3, %v1652_v1  ;;  %v2261_v5 = vpop.f32.mrb[9].mxu0 }
 0x7d2   :  { %v2262_v6 = vadd.f32 %v2261_v5, %v1656_v2  ;;  %v2263_v7 = vpop.f32.mrb[10].mxu0 }
 0x7d3   :  { %v2583_v8 = vmul.f32 -1.442695, %v2260_v4  ;;  %v2264_v9 = vpop.f32.mrb[11].mxu0 }
 0x7d4   :  { %v2584_v10 = vmul.f32 -1.442695, %v2262_v6 }
 0x7d5   :  { %3118 = vpow2.f32 %v2583_v8 }
 0x7d6   :  { %3120 = vpow2.f32 %v2584_v10 }
 0x7df   :  { %v3119_v11 = vpop.eup %3118 }
 0x7e0   :  { %v3121_v12 = vpop.eup %3120  ;;  %v2288_v13 = vadd.f32 1.0, %v3119_v11 }
 0x7e1   :  { %v2289_v57 = vadd.f32 1.0, %v3121_v12 }
 0x7e2   :  { %3122 = vrcp.f32 %v2288_v13 }
 0x7e3   :  { %3124 = vrcp.f32 %v2289_v57 }
 0x7ec   :  { %v3123_v14 = vpop.eup %3122 }
 0x7ed   :  { %v3125_v59 = vpop.eup %3124  ;;  %2306 = vst [vmem:[%s4046_s3 + $0x20] sm:$0xff] %v3123_v14 }
 0x7ee   :  { %2307 = vst [vmem:[%s4046_s3 + $0x28] sm:$0xff] %v3125_v59 }

</bundles_post_ra>
